<compile_context>
chip_gen: v5e
topology: v5e:2x2
jax: 0.10.0
libtpu: 0.0.40
codegen_flags: <defaults>
</compile_context>

<pallas_src>
import functools

import jax
import jax.numpy as jnp
from jax import lax
from jax.experimental import pallas as pl
from jax.experimental.pallas import tpu as pltpu

EPS = 1e-5


def _bn_relu_conv1x1_kernel(x_ref, gamma_ref, beta_ref, w_ref, o_ref, *, inv_p):
    # x_ref:     (P_pad, Cin) f32, rows >= true P are zero padding
    # gamma_ref: (1, Cin) f32
    # beta_ref:  (1, Cin) f32
    # w_ref:     (Cin, TN) f32 weight slab for this grid step
    # o_ref:     (P_pad, TN)
    x = x_ref[...]

    # One-pass batch statistics.  Zero-padded rows contribute nothing to either
    # sum; divide by the true row count (inv_p = 1 / (N*H*W)).
    s1 = jnp.sum(x, axis=0, keepdims=True)        # (1, Cin)
    s2 = jnp.sum(x * x, axis=0, keepdims=True)    # (1, Cin)
    mean = s1 * inv_p
    var = s2 * inv_p - mean * mean                # biased variance (training-mode BN)

    # Fold BN affine into a single scale/shift:  y = relu(x * scale + shift)
    scale = gamma_ref[...] * lax.rsqrt(var + EPS)  # (1, Cin)
    shift = beta_ref[...] - mean * scale           # (1, Cin)

    y = jnp.maximum(x * scale + shift, 0.0)

    # 1x1 conv == channel matmul on the MXU.
    o_ref[...] = jnp.dot(y, w_ref[...],
                         preferred_element_type=jnp.float32).astype(o_ref.dtype)


def bn_relu_conv1x1(x_nchw, gamma, beta, w_io, *, n_cout_blocks=4):
    """x_nchw: (N, Cin, H, W); gamma/beta: (Cin,); w_io: (Cin, Cout) -- weight
    already transposed once at parameter-init time."""
    n, cin, h, wd = x_nchw.shape
    cout = w_io.shape[1]
    p = n * h * wd
    p_pad = ((p + 7) // 8) * 8                     # clean 8-row sublane tiling

    # NCHW -> NHWC -> (P, Cin), zero-pad rows to P_pad.
    x_flat = jnp.transpose(x_nchw, (0, 2, 3, 1)).reshape(p, cin).astype(jnp.float32)
    if p_pad != p:
        x_flat = jnp.pad(x_flat, ((0, p_pad - p), (0, 0)))

    gamma2 = gamma.reshape(1, cin).astype(jnp.float32)
    beta2 = beta.reshape(1, cin).astype(jnp.float32)

    assert cout % n_cout_blocks == 0
    tn = cout // n_cout_blocks
    assert tn % 128 == 0

    kernel = functools.partial(_bn_relu_conv1x1_kernel, inv_p=1.0 / p)

    itemsize = 4  # f32 everywhere
    cost = pl.CostEstimate(
        flops=2 * p_pad * cin * cout,
        transcendentals=cin,                        # rsqrt per channel (per step)
        bytes_accessed=(p_pad * cin + cin * cout + p_pad * cout + 2 * cin) * itemsize,
    )

    out_flat = pl.pallas_call(
        kernel,
        out_shape=jax.ShapeDtypeStruct((p_pad, cout), x_nchw.dtype),
        grid_spec=pltpu.PrefetchScalarGridSpec(
            num_scalar_prefetch=0,
            grid=(n_cout_blocks,),
            in_specs=[
                pl.BlockSpec((p_pad, cin), lambda j: (0, 0)),   # x: resident across steps
                pl.BlockSpec((1, cin), lambda j: (0, 0)),       # gamma
                pl.BlockSpec((1, cin), lambda j: (0, 0)),       # beta
                pl.BlockSpec((cin, tn), lambda j: (0, j)),      # weight slab per step
            ],
            out_specs=pl.BlockSpec((p_pad, tn), lambda j: (0, j)),
        ),
        compiler_params=pltpu.CompilerParams(
            dimension_semantics=("parallel",),      # Cout blocks are independent
        ),
        cost_estimate=cost,
    )(x_flat, gamma2, beta2, w_io)

    # (P_pad, Cout) -> drop padding -> NHWC -> NCHW
    out = out_flat[:p].reshape(n, h, wd, cout)
    return jnp.transpose(out, (0, 3, 1, 2))


def reference(x_nchw, gamma, beta, w_oi):
    """Pure-JAX reference of the same forward pass (w_oi is (Cout, Cin))."""
    xf = x_nchw.astype(jnp.float32)
    mean = jnp.mean(xf, axis=(0, 2, 3), keepdims=True)
    var = jnp.mean((xf - mean) ** 2, axis=(0, 2, 3), keepdims=True)
    xh = (xf - mean) / jnp.sqrt(var + EPS)
    y = gamma.reshape(1, -1, 1, 1) * xh + beta.reshape(1, -1, 1, 1)
    y = jnp.maximum(y, 0.0)
    return jnp.einsum("nchw,oc->nohw", y, w_oi)


if __name__ == "__main__":
    key = jax.random.PRNGKey(0)
    k_x, k_g, k_b, k_w = jax.random.split(key, 4)

    N, CIN, H, W, COUT = 1, 256, 14, 14, 1024

    x = jax.random.normal(k_x, (N, CIN, H, W), dtype=jnp.float32)
    # Deterministic, non-trivial parameter init (synthetic; not a checkpoint load)
    gamma = 1.0 + 0.1 * jax.random.normal(k_g, (CIN,), dtype=jnp.float32)
    beta = 0.1 * jax.random.normal(k_b, (CIN,), dtype=jnp.float32)
    w_oi = jax.random.normal(k_w, (COUT, CIN), dtype=jnp.float32) * (1.0 / jnp.sqrt(CIN))

    # Weight transpose done once at "parameter-init time", not per call.
    w_io = jnp.transpose(w_oi, (1, 0))              # (Cin, Cout)

    run = jax.jit(bn_relu_conv1x1)
    out = run(x, gamma, beta, w_io)
    jax.block_until_ready(out)

    ref = reference(x, gamma, beta, w_oi)
    assert out.shape == (N, COUT, H, W), out.shape
    assert jnp.allclose(out, ref, atol=1e-3, rtol=1e-3), "mismatch vs reference"

    print("KERNEL_OK")
</pallas_src>

<mosaic_0001>
module attributes {stable_mosaic.version = 11 : i64} {
  func.func @_bn_relu_conv1x1_kernel(%arg0: i32, %arg1: memref<200x256xf32, #tpu.memory_space<vmem>>, %arg2: memref<1x256xf32, #tpu.memory_space<vmem>>, %arg3: memref<1x256xf32, #tpu.memory_space<vmem>>, %arg4: memref<256x256xf32, #tpu.memory_space<vmem>>, %arg5: memref<200x256xf32, #tpu.memory_space<vmem>>) attributes {dimension_semantics = [#tpu.dimension_semantics<parallel>], iteration_bounds = array<i64: 4>, scalar_prefetch = 0 : i64, scratch_operands = 0 : i64, tpu.core_type = #tpu.core_type<tc>, window_params = [{pipeline_mode = #tpu.pipeline_mode<synchronous>, transform_indices = @transform_0, window_bounds = array<i64: 200, 256>}, {pipeline_mode = #tpu.pipeline_mode<synchronous>, transform_indices = @transform_1, window_bounds = array<i64: 1, 256>}, {pipeline_mode = #tpu.pipeline_mode<synchronous>, transform_indices = @transform_2, window_bounds = array<i64: 1, 256>}, {transform_indices = @transform_3, window_bounds = array<i64: 256, 256>}, {transform_indices = @transform_4, window_bounds = array<i64: 200, 256>}]} {
    %c0 = arith.constant 0 : index
    %c0_0 = arith.constant 0 : index
    %0 = vector.load %arg1[%c0, %c0_0] : memref<200x256xf32, #tpu.memory_space<vmem>>, vector<200x256xf32>
    %cst = arith.constant dense<0.000000e+00> : vector<256xf32>
    %1 = vector.multi_reduction <add>, %0, %cst [0] : vector<200x256xf32> to vector<256xf32>
    %2 = vector.shape_cast %1 : vector<256xf32> to vector<1x256xf32>
    %3 = arith.mulf %0, %0 : vector<200x256xf32>
    %cst_1 = arith.constant dense<0.000000e+00> : vector<256xf32>
    %4 = vector.multi_reduction <add>, %3, %cst_1 [0] : vector<200x256xf32> to vector<256xf32>
    %5 = vector.shape_cast %4 : vector<256xf32> to vector<1x256xf32>
    %cst_2 = arith.constant 0.00510204071 : f32
    %6 = vector.broadcast %cst_2 : f32 to vector<1x256xf32>
    %7 = arith.mulf %2, %6 : vector<1x256xf32>
    %cst_3 = arith.constant 0.00510204071 : f32
    %8 = vector.broadcast %cst_3 : f32 to vector<1x256xf32>
    %9 = arith.mulf %5, %8 : vector<1x256xf32>
    %10 = arith.mulf %7, %7 : vector<1x256xf32>
    %11 = arith.subf %9, %10 : vector<1x256xf32>
    %c0_4 = arith.constant 0 : index
    %c0_5 = arith.constant 0 : index
    %12 = vector.load %arg2[%c0_4, %c0_5] : memref<1x256xf32, #tpu.memory_space<vmem>>, vector<1x256xf32>
    %cst_6 = arith.constant 9.99999974E-6 : f32
    %13 = vector.broadcast %cst_6 : f32 to vector<1x256xf32>
    %14 = arith.addf %11, %13 : vector<1x256xf32>
    %15 = math.rsqrt %14 : vector<1x256xf32>
    %16 = arith.mulf %12, %15 : vector<1x256xf32>
    %c0_7 = arith.constant 0 : index
    %c0_8 = arith.constant 0 : index
    %17 = vector.load %arg3[%c0_7, %c0_8] : memref<1x256xf32, #tpu.memory_space<vmem>>, vector<1x256xf32>
    %18 = arith.mulf %7, %16 : vector<1x256xf32>
    %19 = arith.subf %17, %18 : vector<1x256xf32>
    %20 = vector.broadcast %16 : vector<1x256xf32> to vector<200x256xf32>
    %21 = arith.mulf %0, %20 : vector<200x256xf32>
    %22 = vector.broadcast %19 : vector<1x256xf32> to vector<200x256xf32>
    %23 = arith.addf %21, %22 : vector<200x256xf32>
    %cst_9 = arith.constant 0.000000e+00 : f32
    %24 = vector.broadcast %cst_9 : f32 to vector<200x256xf32>
    %25 = arith.maximumf %23, %24 : vector<200x256xf32>
    %c0_10 = arith.constant 0 : index
    %c0_11 = arith.constant 0 : index
    %26 = vector.load %arg4[%c0_10, %c0_11] : memref<256x256xf32, #tpu.memory_space<vmem>>, vector<256x256xf32>
    %cst_12 = arith.constant dense<0.000000e+00> : vector<200x256xf32>
    %27 = tpu.matmul %25, %26, %cst_12 {dimension_numbers = #tpu.dot_dimension_numbers<[1], [0], [0], [1], [0, 0, 1, 1], [], []>} : vector<200x256xf32>, vector<256x256xf32>, vector<200x256xf32> -> vector<200x256xf32>
    %c0_13 = arith.constant 0 : index
    %c0_14 = arith.constant 0 : index
    %28 = vector.load %arg5[%c0_13, %c0_14] : memref<200x256xf32, #tpu.memory_space<vmem>>, vector<200x256xf32>
    tpu.vector_store %arg5[%c0_13, %c0_14], %27 {strides = array<i32>} : memref<200x256xf32, #tpu.memory_space<vmem>>, vector<200x256xf32>,
    return
  }
  func.func @transform_0(%arg0: i32) -> (i32, i32) {
    %c0_i32 = arith.constant 0 : i32
    %c0_i32_0 = arith.constant 0 : i32
    %c0_i32_1 = arith.constant 0 : i32
    return %c0_i32, %c0_i32_0 : i32, i32
  }
  func.func @transform_1(%arg0: i32) -> (i32, i32) {
    %c0_i32 = arith.constant 0 : i32
    %c0_i32_0 = arith.constant 0 : i32
    %c0_i32_1 = arith.constant 0 : i32
    return %c0_i32, %c0_i32_0 : i32, i32
  }
  func.func @transform_2(%arg0: i32) -> (i32, i32) {
    %c0_i32 = arith.constant 0 : i32
    %c0_i32_0 = arith.constant 0 : i32
    %c0_i32_1 = arith.constant 0 : i32
    return %c0_i32, %c0_i32_0 : i32, i32
  }
  func.func @transform_3(%arg0: i32) -> (i32, i32) {
    %c0_i32 = arith.constant 0 : i32
    %c0_i32_0 = arith.constant 0 : i32
    return %c0_i32, %arg0 : i32, i32
  }
  func.func @transform_4(%arg0: i32) -> (i32, i32) {
    %c0_i32 = arith.constant 0 : i32
    %c0_i32_0 = arith.constant 0 : i32
    return %c0_i32, %arg0 : i32, i32
  }
}

</mosaic_0001>

<bundles_post_ra>
// kernel: bn_relu_conv1x1.1
= control target key start
LH: loop header
LB: loop body
LE: loop exit
PB: predicated region body
PF: predicated region fallthrough
CT: control target
= control target key end

     0   :  { %s1523_s15 = smov 0   ;;  %s1525_s16 = smov 0   ;;  %s2505_s0 = inlined_call_operand.vmem [shape: f32[200,256], index: 0, kind: input, shape index: {}]   ;;  %s2506_s1 = inlined_call_operand.vmem [shape: f32[1,256], index: 1, kind: input, shape index: {}]   ;;  %s2507_s2 = inlined_call_operand.vmem [shape: f32[1,256], index: 2, kind: input, shape index: {}]   ;;  %s2508_s3 = inlined_call_operand.vmem [shape: f32[256,1024], index: 3, kind: input, shape index: {}]   ;;  %s2509_s4 = inlined_call_operand.vmem [shape: f32[200,1024], index: 4, kind: output, shape index: {}]  }
   0x1   :  { %s1527_s17 = smov 0  }
   0x2 LB: > { %s1430_s18 = sadd.s32 4294967295, %s1496_s17   ;;  %s1540_s19 = sadd.s32 1, %s1496_s17   ;;  %s1496_s17 = sphi %s1527_s17, %s2558_s17   ;;  %s1492_s16 = sphi %s1525_s16, %s2557_s16   ;;  %s1488_s15 = sphi %s1523_s15, %s2556_s15  }
   0x3   : > { %s81_s20 = ssub.s32 %s1496_s17, %s1540_s19  ;;  %s84_s21 = sadd.s32 1, %s1492_s16 }
   0x4   : > { %p82_p0 = scmp.eq.s32.totalorder %s81_s20, 0  ;;  %p91_p1 = scmp.ne.s32.totalorder %s1492_s16, %s1488_s15 }
   0x5   : > { %p92_p2 = scmp.eq.s32.totalorder %s1496_s17, 0  ;;  %p121_p3 = scmp.eq.s32.totalorder %s1430_s18, 3 }
   0x6   : > { %s1551_s22 = scalar_select %p82_p0, %s1492_s16, %s84_s21  }
   0x7   : > { %p93_p4 = por %p92_p2, %p91_p1  ;;  %p1553_p5 = por %p121_p3, %p91_p1 }
   0x8   : > { %p1433_p6 = scmp.ge.s32.totalorder %s1496_s17, 4 }
   0xa   : > { %152 = sbr.rel (%p1433_p6) target bundleno = 83 (0x53), region = 28 }
   0xf   : > { %155 = sbr.rel (!%p93_p4) target bundleno = 83 (0x53), region = 32  ;;  %s157_s24 = sand.u32 (%p93_p4), 1, %s1492_s16  }
  0x10   : > { %s1443_s25 = sshll.u32 (%p93_p4), %s1496_s17, 4  ;;  %s1434_s26 = sshll.u32 (%p93_p4), %s157_s24, 9 }
  0x11   : > { %s1563_s29 = scalar_lea.vmem (%p93_p4), %s2508_s3, %s1443_s25  ;;  %s1568_s30 = scalar_lea.vmem (%p93_p4), [#allocation2], %s1434_s26 }
  0x12   : > { %v175_v0 = vld [vmem:[%s1563_s29] sm:$0xff] (%p93_p4)  ;;  %v177_v1 = vld [vmem:[%s1563_s29 + $0x8] sm:$0xff] (%p93_p4) }
  0x13   : > { %v179_v2 = vld [vmem:[%s1563_s29 + $0x40] sm:$0xff] (%p93_p4)  ;;  %176 = vst [vmem:[%s1568_s30] sm:$0xff] (%p93_p4), %v175_v0  ;;  %v181_v3 = vld [vmem:[%s1563_s29 + $0x48] sm:$0xff] (%p93_p4) }
  0x14   : > { %178 = vst [vmem:[%s1568_s30 + $0x8] sm:$0xff] %v177_v1  ;;  %v183_v4 = vld [vmem:[%s1563_s29 + $0x80] sm:$0xff]  ;;  %v185_v5 = vld [vmem:[%s1563_s29 + $0x88] sm:$0xff] }
  0x15   : > { %180 = vst [vmem:[%s1568_s30 + $0x10] sm:$0xff] %v179_v2  ;;  %v187_v6 = vld [vmem:[%s1563_s29 + $0xc0] sm:$0xff]  ;;  %v189_v7 = vld [vmem:[%s1563_s29 + $0xc8] sm:$0xff] }
  0x16   : > { %182 = vst [vmem:[%s1568_s30 + $0x18] sm:$0xff] %v181_v3  ;;  %v191_v8 = vld [vmem:[%s1563_s29 + $0x100] sm:$0xff]  ;;  %v193_v9 = vld [vmem:[%s1563_s29 + $0x108] sm:$0xff] }
  0x17   : > { %184 = vst [vmem:[%s1568_s30 + $0x20] sm:$0xff] %v183_v4  ;;  %v195_v10 = vld [vmem:[%s1563_s29 + $0x140] sm:$0xff]  ;;  %v197_v11 = vld [vmem:[%s1563_s29 + $0x148] sm:$0xff] }
  0x18   : > { %186 = vst [vmem:[%s1568_s30 + $0x28] sm:$0xff] %v185_v5  ;;  %v199_v12 = vld [vmem:[%s1563_s29 + $0x180] sm:$0xff]  ;;  %v201_v13 = vld [vmem:[%s1563_s29 + $0x188] sm:$0xff] }
  0x19   : > { %188 = vst [vmem:[%s1568_s30 + $0x30] sm:$0xff] %v187_v6  ;;  %v203_v14 = vld [vmem:[%s1563_s29 + $0x1c0] sm:$0xff]  ;;  %v205_v15 = vld [vmem:[%s1563_s29 + $0x1c8] sm:$0xff] }
  0x1a   : > { %190 = vst [vmem:[%s1568_s30 + $0x38] sm:$0xff] %v189_v7  ;;  %v207_v16 = vld [vmem:[%s1563_s29 + $0x200] sm:$0xff]  ;;  %v209_v17 = vld [vmem:[%s1563_s29 + $0x208] sm:$0xff] }
  0x1b   : > { %192 = vst [vmem:[%s1568_s30 + $0x40] sm:$0xff] %v191_v8  ;;  %v211_v18 = vld [vmem:[%s1563_s29 + $0x240] sm:$0xff]  ;;  %v213_v19 = vld [vmem:[%s1563_s29 + $0x248] sm:$0xff] }
  0x1c   : > { %194 = vst [vmem:[%s1568_s30 + $0x48] sm:$0xff] %v193_v9  ;;  %v215_v20 = vld [vmem:[%s1563_s29 + $0x280] sm:$0xff]  ;;  %v217_v21 = vld [vmem:[%s1563_s29 + $0x288] sm:$0xff] }
  0x1d   : > { %196 = vst [vmem:[%s1568_s30 + $0x50] sm:$0xff] %v195_v10  ;;  %v219_v22 = vld [vmem:[%s1563_s29 + $0x2c0] sm:$0xff]  ;;  %v221_v23 = vld [vmem:[%s1563_s29 + $0x2c8] sm:$0xff] }
  0x1e   : > { %198 = vst [vmem:[%s1568_s30 + $0x58] sm:$0xff] %v197_v11  ;;  %v223_v24 = vld [vmem:[%s1563_s29 + $0x300] sm:$0xff]  ;;  %v225_v25 = vld [vmem:[%s1563_s29 + $0x308] sm:$0xff] }
  0x1f   : > { %200 = vst [vmem:[%s1568_s30 + $0x60] sm:$0xff] %v199_v12  ;;  %v227_v26 = vld [vmem:[%s1563_s29 + $0x340] sm:$0xff]  ;;  %v229_v27 = vld [vmem:[%s1563_s29 + $0x348] sm:$0xff] }
  0x20   : > { %202 = vst [vmem:[%s1568_s30 + $0x68] sm:$0xff] %v201_v13  ;;  %v231_v28 = vld [vmem:[%s1563_s29 + $0x380] sm:$0xff]  ;;  %v233_v29 = vld [vmem:[%s1563_s29 + $0x388] sm:$0xff] }
  0x21   : > { %204 = vst [vmem:[%s1568_s30 + $0x70] sm:$0xff] %v203_v14  ;;  %v235_v30 = vld [vmem:[%s1563_s29 + $0x3c0] sm:$0xff]  ;;  %v237_v31 = vld [vmem:[%s1563_s29 + $0x3c8] sm:$0xff] }
  0x22   : > { %206 = vst [vmem:[%s1568_s30 + $0x78] sm:$0xff] %v205_v15  ;;  %v239_v32 = vld [vmem:[%s1563_s29 + $0x400] sm:$0xff]  ;;  %v241_v33 = vld [vmem:[%s1563_s29 + $0x408] sm:$0xff] }
  0x23   : > { %208 = vst [vmem:[%s1568_s30 + $0x80] sm:$0xff] %v207_v16  ;;  %v243_v34 = vld [vmem:[%s1563_s29 + $0x440] sm:$0xff]  ;;  %v245_v35 = vld [vmem:[%s1563_s29 + $0x448] sm:$0xff] }
  0x24   : > { %210 = vst [vmem:[%s1568_s30 + $0x88] sm:$0xff] %v209_v17  ;;  %v247_v36 = vld [vmem:[%s1563_s29 + $0x480] sm:$0xff]  ;;  %v249_v37 = vld [vmem:[%s1563_s29 + $0x488] sm:$0xff] }
  0x25   : > { %212 = vst [vmem:[%s1568_s30 + $0x90] sm:$0xff] %v211_v18  ;;  %v251_v38 = vld [vmem:[%s1563_s29 + $0x4c0] sm:$0xff]  ;;  %v253_v39 = vld [vmem:[%s1563_s29 + $0x4c8] sm:$0xff] }
  0x26   : > { %214 = vst [vmem:[%s1568_s30 + $0x98] sm:$0xff] %v213_v19  ;;  %v255_v40 = vld [vmem:[%s1563_s29 + $0x500] sm:$0xff]  ;;  %v257_v41 = vld [vmem:[%s1563_s29 + $0x508] sm:$0xff] }
  0x27   : > { %216 = vst [vmem:[%s1568_s30 + $0xa0] sm:$0xff] %v215_v20  ;;  %v259_v42 = vld [vmem:[%s1563_s29 + $0x540] sm:$0xff]  ;;  %v261_v43 = vld [vmem:[%s1563_s29 + $0x548] sm:$0xff] }
  0x28   : > { %218 = vst [vmem:[%s1568_s30 + $0xa8] sm:$0xff] %v217_v21  ;;  %v263_v44 = vld [vmem:[%s1563_s29 + $0x580] sm:$0xff]  ;;  %v265_v45 = vld [vmem:[%s1563_s29 + $0x588] sm:$0xff] }
  0x29   : > { %220 = vst [vmem:[%s1568_s30 + $0xb0] sm:$0xff] %v219_v22  ;;  %v267_v46 = vld [vmem:[%s1563_s29 + $0x5c0] sm:$0xff]  ;;  %v269_v47 = vld [vmem:[%s1563_s29 + $0x5c8] sm:$0xff] }
  0x2a   : > { %222 = vst [vmem:[%s1568_s30 + $0xb8] sm:$0xff] %v221_v23  ;;  %v271_v48 = vld [vmem:[%s1563_s29 + $0x600] sm:$0xff]  ;;  %v273_v49 = vld [vmem:[%s1563_s29 + $0x608] sm:$0xff] }
  0x2b   : > { %224 = vst [vmem:[%s1568_s30 + $0xc0] sm:$0xff] %v223_v24  ;;  %v275_v50 = vld [vmem:[%s1563_s29 + $0x640] sm:$0xff]  ;;  %v277_v51 = vld [vmem:[%s1563_s29 + $0x648] sm:$0xff] }
  0x2c   : > { %226 = vst [vmem:[%s1568_s30 + $0xc8] sm:$0xff] %v225_v25  ;;  %v279_v52 = vld [vmem:[%s1563_s29 + $0x680] sm:$0xff]  ;;  %v281_v53 = vld [vmem:[%s1563_s29 + $0x688] sm:$0xff] }
  0x2d   : > { %228 = vst [vmem:[%s1568_s30 + $0xd0] sm:$0xff] %v227_v26  ;;  %v283_v54 = vld [vmem:[%s1563_s29 + $0x6c0] sm:$0xff]  ;;  %v285_v55 = vld [vmem:[%s1563_s29 + $0x6c8] sm:$0xff] }
  0x2e   : > { %230 = vst [vmem:[%s1568_s30 + $0xd8] sm:$0xff] %v229_v27  ;;  %v287_v56 = vld [vmem:[%s1563_s29 + $0x700] sm:$0xff]  ;;  %v289_v57 = vld [vmem:[%s1563_s29 + $0x708] sm:$0xff] }
  0x2f   : > { %232 = vst [vmem:[%s1568_s30 + $0xe0] sm:$0xff] %v231_v28  ;;  %v291_v58 = vld [vmem:[%s1563_s29 + $0x740] sm:$0xff]  ;;  %v293_v59 = vld [vmem:[%s1563_s29 + $0x748] sm:$0xff] }
  0x30   : > { %234 = vst [vmem:[%s1568_s30 + $0xe8] sm:$0xff] %v233_v29  ;;  %v295_v60 = vld [vmem:[%s1563_s29 + $0x780] sm:$0xff]  ;;  %v297_v61 = vld [vmem:[%s1563_s29 + $0x788] sm:$0xff] }
  0x31   : > { %236 = vst [vmem:[%s1568_s30 + $0xf0] sm:$0xff] %v235_v30  ;;  %v299_v62 = vld [vmem:[%s1563_s29 + $0x7c0] sm:$0xff]  ;;  %v301_v63 = vld [vmem:[%s1563_s29 + $0x7c8] sm:$0xff] }
  0x32   : > { %238 = vst [vmem:[%s1568_s30 + $0xf8] sm:$0xff] %v237_v31 }
  0x33   : > { %240 = vst [vmem:[%s1568_s30 + $0x100] sm:$0xff] %v239_v32 }
  0x34   : > { %242 = vst [vmem:[%s1568_s30 + $0x108] sm:$0xff] %v241_v33 }
  0x35   : > { %244 = vst [vmem:[%s1568_s30 + $0x110] sm:$0xff] %v243_v34 }
  0x36   : > { %246 = vst [vmem:[%s1568_s30 + $0x118] sm:$0xff] %v245_v35 }
  0x37   : > { %248 = vst [vmem:[%s1568_s30 + $0x120] sm:$0xff] %v247_v36 }
  0x38   : > { %250 = vst [vmem:[%s1568_s30 + $0x128] sm:$0xff] %v249_v37 }
  0x39   : > { %252 = vst [vmem:[%s1568_s30 + $0x130] sm:$0xff] %v251_v38 }
  0x3a   : > { %254 = vst [vmem:[%s1568_s30 + $0x138] sm:$0xff] %v253_v39 }
  0x3b   : > { %256 = vst [vmem:[%s1568_s30 + $0x140] sm:$0xff] %v255_v40 }
  0x3c   : > { %258 = vst [vmem:[%s1568_s30 + $0x148] sm:$0xff] %v257_v41 }
  0x3d   : > { %260 = vst [vmem:[%s1568_s30 + $0x150] sm:$0xff] %v259_v42 }
  0x3e   : > { %262 = vst [vmem:[%s1568_s30 + $0x158] sm:$0xff] %v261_v43 }
  0x3f   : > { %264 = vst [vmem:[%s1568_s30 + $0x160] sm:$0xff] %v263_v44 }
  0x40   : > { %266 = vst [vmem:[%s1568_s30 + $0x168] sm:$0xff] %v265_v45 }
  0x41   : > { %268 = vst [vmem:[%s1568_s30 + $0x170] sm:$0xff] %v267_v46 }
  0x42   : > { %270 = vst [vmem:[%s1568_s30 + $0x178] sm:$0xff] %v269_v47 }
  0x43   : > { %272 = vst [vmem:[%s1568_s30 + $0x180] sm:$0xff] %v271_v48 }
  0x44   : > { %274 = vst [vmem:[%s1568_s30 + $0x188] sm:$0xff] %v273_v49 }
  0x45   : > { %276 = vst [vmem:[%s1568_s30 + $0x190] sm:$0xff] %v275_v50 }
  0x46   : > { %278 = vst [vmem:[%s1568_s30 + $0x198] sm:$0xff] %v277_v51 }
  0x47   : > { %280 = vst [vmem:[%s1568_s30 + $0x1a0] sm:$0xff] %v279_v52 }
  0x48   : > { %282 = vst [vmem:[%s1568_s30 + $0x1a8] sm:$0xff] %v281_v53 }
  0x49   : > { %284 = vst [vmem:[%s1568_s30 + $0x1b0] sm:$0xff] %v283_v54 }
  0x4a   : > { %286 = vst [vmem:[%s1568_s30 + $0x1b8] sm:$0xff] %v285_v55 }
  0x4b   : > { %288 = vst [vmem:[%s1568_s30 + $0x1c0] sm:$0xff] %v287_v56 }
  0x4c   : > { %290 = vst [vmem:[%s1568_s30 + $0x1c8] sm:$0xff] %v289_v57 }
  0x4d   : > { %292 = vst [vmem:[%s1568_s30 + $0x1d0] sm:$0xff] %v291_v58 }
  0x4e   : > { %294 = vst [vmem:[%s1568_s30 + $0x1d8] sm:$0xff] %v293_v59 }
  0x4f   : > { %296 = vst [vmem:[%s1568_s30 + $0x1e0] sm:$0xff] %v295_v60 }
  0x50   : > { %298 = vst [vmem:[%s1568_s30 + $0x1e8] sm:$0xff] %v297_v61 }
  0x51   : > { %300 = vst [vmem:[%s1568_s30 + $0x1f0] sm:$0xff] %v299_v62 }
  0x52   : > { %302 = vst [vmem:[%s1568_s30 + $0x1f8] sm:$0xff] %v301_v63 }
  0x53 PF: > { %p1437_p7 = scmp.ge.s32.totalorder %s1496_s17, 1  ;;  %p307_p8 = scmp.lt.s32.totalorder %s1496_s17, 5 }
  0x55   : > { %p308_p9 = pnand %p1437_p7, %p307_p8 }
  0x57   : > { %311 = sbr.rel (%p308_p9) target bundleno = 557 (0x22d), region = 55 }
  0x5c   : > { %s314_s5 = sand.u32 1, %s1488_s15   ;;  %v1703_v0 = vld [vmem:[%s2505_s0] sm:$0xff]  ;;  %v1715_v6 = vld [vmem:[%s2505_s0 + $0x10] sm:$0xff]  ;;  %v1725_v12 = vld [vmem:[%s2505_s0 + $0x8] sm:$0xff]  ;;  %vm594_vm6 = vcmask 1040384   ;;  %s1444_s15 = sshll.u32 (%p1553_p5), %s1430_s18, 4 }
  0x5d   : > { %s1438_s6 = sshll.u32 %s314_s5, 9  ;;  %v1732_v15 = vld [vmem:[%s2505_s0 + $0x18] sm:$0xff]  ;;  %v390_v16 = vadd.f32 %v1715_v6, %v1703_v0  ;;  %v1741_v19 = vld [vmem:[%s2505_s0 + $0x20] sm:$0xff]  ;;  %v1752_v26 = vld [vmem:[%s2505_s0 + $0x28] sm:$0xff]  ;;  %v450_v56 = vmul.f32 %v1703_v0, %v1703_v0  ;;  %v452_v57 = vmul.f32 %v1715_v6, %v1715_v6  ;;  %s1445_s8 = smul.u32 400, %s314_s5 }
  0x5e   : > { %s1705_s9 = scalar_lea.vmem [#allocation2], %s1438_s6  ;;  %v420_v28 = vadd.f32 %v1732_v15, %v1725_v12  ;;  %v1762_v31 = vld [vmem:[%s2505_s0 + $0x30] sm:$0xff]  ;;  %v1773_v38 = vld [vmem:[%s2505_s0 + $0x38] sm:$0xff]  ;;  %v1782_v43 = vld [vmem:[%s2505_s0 + $0x40] sm:$0xff]  ;;  %s2395_s23 = scalar_lea.vmem (%p1553_p5), %s2509_s4, %s1444_s15 }
  0x5f   : > { %v798_v1 = vld [vmem:[%s1705_s9 + $0xf8] sm:$0xff]  ;;  %v796_v3 = vld [vmem:[%s1705_s9 + $0xe8] sm:$0xff]  ;;  %v797_v8 = vld [vmem:[%s1705_s9 + $0xf0] sm:$0xff]  ;;  %v391_v27 = vadd.f32 %v390_v16, %v1741_v19  ;;  %s2292_s10 = scalar_lea.vmem [#allocation3], %s1445_s8 }
  0x60   : > { %v830_v2 = vld [vmem:[%s1705_s9 + $0x1f8] sm:$0xff]  ;;  %1015 = vmatpush.msra.mxu2 %v798_v1  ;;  %v828_v4 = vld [vmem:[%s1705_s9 + $0x1e8] sm:$0xff]  ;;  %v829_v9 = vld [vmem:[%s1705_s9 + $0x1f0] sm:$0xff]  ;;  %831 = vmatpush.msra.mxu0 %v797_v8  ;;  %v421_v40 = vadd.f32 %v420_v28, %v1752_v26 }
  0x61   : > { %1107 = vmatpush.msra.mxu3 %v830_v2  ;;  %v794_v5 = vld [vmem:[%s1705_s9 + $0xd8] sm:$0xff]  ;;  %v795_v10 = vld [vmem:[%s1705_s9 + $0xe0] sm:$0xff]  ;;  %923 = vmatpush.msra.mxu1 %v829_v9  ;;  %v792_v13 = vld [vmem:[%s1705_s9 + $0xc8] sm:$0xff]  ;;  %v392_v39 = vadd.f32 %v391_v27, %v1762_v31 }
  0x62   : > { %v826_v7 = vld [vmem:[%s1705_s9 + $0x1d8] sm:$0xff]  ;;  %1016 = vmatpush.msra.mxu2 %v796_v3  ;;  %v827_v11 = vld [vmem:[%s1705_s9 + $0x1e0] sm:$0xff]  ;;  %v824_v14 = vld [vmem:[%s1705_s9 + $0x1c8] sm:$0xff]  ;;  %832 = vmatpush.msra.mxu0 %v795_v10  ;;  %v422_v52 = vadd.f32 %v421_v40, %v1773_v38 }
  0x63   : > { %1108 = vmatpush.msra.mxu3 %v828_v4  ;;  %v793_v17 = vld [vmem:[%s1705_s9 + $0xd0] sm:$0xff]  ;;  %924 = vmatpush.msra.mxu1 %v827_v11  ;;  %v790_v20 = vld [vmem:[%s1705_s9 + $0xb8] sm:$0xff]  ;;  %v791_v22 = vld [vmem:[%s1705_s9 + $0xc0] sm:$0xff]  ;;  %v393_v51 = vadd.f32 %v392_v39, %v1782_v43  ;;  %v453_v11 = vmul.f32 %v1732_v15, %v1732_v15 }
  0x64   : > { %1017 = vmatpush.msra.mxu2 %v794_v5  ;;  %v825_v18 = vld [vmem:[%s1705_s9 + $0x1d0] sm:$0xff]  ;;  %v822_v21 = vld [vmem:[%s1705_s9 + $0x1b8] sm:$0xff]  ;;  %v823_v23 = vld [vmem:[%s1705_s9 + $0x1c0] sm:$0xff]  ;;  %833 = vmatpush.msra.mxu0 %v793_v17 }
  0x65   : > { %1109 = vmatpush.msra.mxu3 %v826_v7  ;;  %925 = vmatpush.msra.mxu1 %v825_v18  ;;  %v788_v24 = vld [vmem:[%s1705_s9 + $0xa8] sm:$0xff]  ;;  %v789_v29 = vld [vmem:[%s1705_s9 + $0xb0] sm:$0xff]  ;;  %v786_v32 = vld [vmem:[%s1705_s9 + $0x98] sm:$0xff]  ;;  %v451_v7 = vmul.f32 %v1725_v12, %v1725_v12 }
  0x66   : > { %1018 = vmatpush.msra.mxu2 %v792_v13  ;;  %v820_v25 = vld [vmem:[%s1705_s9 + $0x1a8] sm:$0xff]  ;;  %v821_v30 = vld [vmem:[%s1705_s9 + $0x1b0] sm:$0xff]  ;;  %834 = vmatpush.msra.mxu0 %v791_v22  ;;  %v818_v33 = vld [vmem:[%s1705_s9 + $0x198] sm:$0xff]  ;;  %v454_v13 = vmul.f32 %v1741_v19, %v1741_v19 }
  0x67   : > { %1110 = vmatpush.msra.mxu3 %v824_v14  ;;  %926 = vmatpush.msra.mxu1 %v823_v23  ;;  %v787_v34 = vld [vmem:[%s1705_s9 + $0xa0] sm:$0xff]  ;;  %v784_v36 = vld [vmem:[%s1705_s9 + $0x88] sm:$0xff]  ;;  %v785_v41 = vld [vmem:[%s1705_s9 + $0x90] sm:$0xff]  ;;  %v500_v14 = vadd.f32 %v452_v57, %v450_v56  ;;  %v530_v39 = vadd.f32 %v453_v11, %v451_v7 }
  0x68   : > { %1019 = vmatpush.msra.mxu2 %v790_v20  ;;  %v819_v35 = vld [vmem:[%s1705_s9 + $0x1a0] sm:$0xff]  ;;  %835 = vmatpush.msra.mxu0 %v789_v29  ;;  %v816_v37 = vld [vmem:[%s1705_s9 + $0x188] sm:$0xff]  ;;  %v817_v42 = vld [vmem:[%s1705_s9 + $0x190] sm:$0xff] }
  0x69   : > { %1111 = vmatpush.msra.mxu3 %v822_v21  ;;  %927 = vmatpush.msra.mxu1 %v821_v30  ;;  %v782_v44 = vld [vmem:[%s1705_s9 + $0x78] sm:$0xff]  ;;  %v783_v46 = vld [vmem:[%s1705_s9 + $0x80] sm:$0xff]  ;;  %v780_v48 = vld [vmem:[%s1705_s9 + $0x68] sm:$0xff] }
  0x6a   : > { %1020 = vmatpush.msra.mxu2 %v788_v24  ;;  %836 = vmatpush.msra.mxu0 %v787_v34  ;;  %v814_v45 = vld [vmem:[%s1705_s9 + $0x178] sm:$0xff]  ;;  %v815_v47 = vld [vmem:[%s1705_s9 + $0x180] sm:$0xff]  ;;  %v812_v49 = vld [vmem:[%s1705_s9 + $0x168] sm:$0xff] }
  0x6b   : > { %1112 = vmatpush.msra.mxu3 %v820_v25  ;;  %928 = vmatpush.msra.mxu1 %v819_v35  ;;  %v778_v50 = vld [vmem:[%s1705_s9 + $0x58] sm:$0xff]  ;;  %v781_v54 = vld [vmem:[%s1705_s9 + $0x70] sm:$0xff]  ;;  %v776_v58 = vld [vmem:[%s1705_s9 + $0x48] sm:$0xff] }
  0x6c   : > { %1021 = vmatpush.msra.mxu2 %v786_v32  ;;  %837 = vmatpush.msra.mxu0 %v785_v41  ;;  %v810_v53 = vld [vmem:[%s1705_s9 + $0x158] sm:$0xff]  ;;  %v813_v55 = vld [vmem:[%s1705_s9 + $0x170] sm:$0xff]  ;;  %v808_v59 = vld [vmem:[%s1705_s9 + $0x148] sm:$0xff]  ;;  %v455_v32 = vmul.f32 %v1752_v26, %v1752_v26 }
  0x6d   : > { %1113 = vmatpush.msra.mxu3 %v818_v33  ;;  %929 = vmatpush.msra.mxu1 %v817_v42  ;;  %v779_v60 = vld [vmem:[%s1705_s9 + $0x60] sm:$0xff]  ;;  %v1807_v62 = vld [vmem:[%s2505_s0 + $0x48] sm:$0xff]  ;;  %v1812_v63 = vld [vmem:[%s2505_s0 + $0x50] sm:$0xff] }
  0x6e   : > { %1022 = vmatpush.msra.mxu2 %v784_v36  ;;  %838 = vmatpush.msra.mxu0 %v783_v46  ;;  %v811_v61 = vld [vmem:[%s1705_s9 + $0x160] sm:$0xff]  ;;  %v777_v1 = vld [vmem:[%s1705_s9 + $0x50] sm:$0xff]  ;;  %v1818_v2 = vld [vmem:[%s2505_s0 + $0x58] sm:$0xff]  ;;  %v394_v4 = vadd.f32 %v393_v51, %v1812_v63  ;;  %v423_v5 = vadd.f32 %v422_v52, %v1807_v62  ;;  %v456_v36 = vmul.f32 %v1762_v31, %v1762_v31 }
  0x6f   : > { %1114 = vmatpush.msra.mxu3 %v816_v37  ;;  %930 = vmatpush.msra.mxu1 %v815_v47  ;;  %v1823_v3 = vld [vmem:[%s2505_s0 + $0x60] sm:$0xff]  ;;  %v809_v8 = vld [vmem:[%s1705_s9 + $0x150] sm:$0xff]  ;;  %v1833_v9 = vld [vmem:[%s2505_s0 + $0x68] sm:$0xff]  ;;  %v501_v37 = vadd.f32 %v500_v14, %v454_v13  ;;  %v457_v51 = vmul.f32 %v1773_v38, %v1773_v38  ;;  %v531_v56 = vadd.f32 %v530_v39, %v455_v32 }
  0x70   : > { %1023 = vmatpush.msra.mxu2 %v782_v44  ;;  %839 = vmatpush.msra.mxu0 %v781_v54  ;;  %v1838_v10 = vld [vmem:[%s2505_s0 + $0x70] sm:$0xff]  ;;  %v774_v16 = vld [vmem:[%s1705_s9 + $0x38] sm:$0xff]  ;;  %v775_v18 = vld [vmem:[%s1705_s9 + $0x40] sm:$0xff]  ;;  %v395_v20 = vadd.f32 %v394_v4, %v1823_v3  ;;  %v424_v21 = vadd.f32 %v423_v5, %v1818_v2  ;;  %v458_v54 = vmul.f32 %v1782_v43, %v1782_v43 }
  0x71   : > { %1115 = vmatpush.msra.mxu3 %v814_v45  ;;  %931 = vmatpush.msra.mxu1 %v813_v55  ;;  %v806_v17 = vld [vmem:[%s1705_s9 + $0x138] sm:$0xff]  ;;  %v807_v22 = vld [vmem:[%s1705_s9 + $0x140] sm:$0xff]  ;;  %v772_v25 = vld [vmem:[%s1705_s9 + $0x28] sm:$0xff]  ;;  %v502_v55 = vadd.f32 %v501_v37, %v456_v36  ;;  %v459_v7 = vmul.f32 %v1807_v62, %v1807_v62  ;;  %v532_v13 = vadd.f32 %v531_v56, %v457_v51 }
  0x72   : > { %1024 = vmatpush.msra.mxu2 %v780_v48  ;;  %840 = vmatpush.msra.mxu0 %v779_v60  ;;  %v1853_v23 = vld [vmem:[%s2505_s0 + $0x78] sm:$0xff]  ;;  %v1858_v24 = vld [vmem:[%s2505_s0 + $0x80] sm:$0xff]  ;;  %v804_v27 = vld [vmem:[%s1705_s9 + $0x128] sm:$0xff]  ;;  %v396_v29 = vadd.f32 %v395_v20, %v1838_v10  ;;  %v425_v30 = vadd.f32 %v424_v21, %v1833_v9  ;;  %v461_v20 = vmul.f32 %v1818_v2, %v1818_v2 }
  0x73   : > { %1116 = vmatpush.msra.mxu3 %v812_v49  ;;  %932 = vmatpush.msra.mxu1 %v811_v61  ;;  %v773_v28 = vld [vmem:[%s1705_s9 + $0x30] sm:$0xff]  ;;  %v1871_v34 = vld [vmem:[%s2505_s0 + $0x88] sm:$0xff]  ;;  %v770_v40 = vld [vmem:[%s1705_s9 + $0x18] sm:$0xff]  ;;  %v503_v11 = vadd.f32 %v502_v55, %v458_v54  ;;  %v462_v21 = vmul.f32 %v1823_v3, %v1823_v3 }
  0x74   : > { %1025 = vmatpush.msra.mxu2 %v778_v50  ;;  %841 = vmatpush.msra.mxu0 %v777_v1  ;;  %v805_v33 = vld [vmem:[%s1705_s9 + $0x130] sm:$0xff]  ;;  %v802_v41 = vld [vmem:[%s1705_s9 + $0x118] sm:$0xff]  ;;  %v397_v42 = vadd.f32 %v396_v29, %v1858_v24  ;;  %v426_v44 = vadd.f32 %v425_v30, %v1853_v23  ;;  %v1892_v46 = vld [vmem:[%s2505_s0 + $0xa0] sm:$0xff]  ;;  %v463_v29 = vmul.f32 %v1833_v9, %v1833_v9 }
  0x75   : > { %1117 = vmatpush.msra.mxu3 %v810_v53  ;;  %933 = vmatpush.msra.mxu1 %v809_v8  ;;  %v1876_v35 = vld [vmem:[%s2505_s0 + $0x90] sm:$0xff]  ;;  %v1887_v45 = vld [vmem:[%s2505_s0 + $0x98] sm:$0xff]  ;;  %v768_v47 = vld [vmem:[%s1705_s9 + $0x8] sm:$0xff]  ;;  %v460_v8 = vmul.f32 %v1812_v63, %v1812_v63  ;;  %v464_v30 = vmul.f32 %v1838_v10, %v1838_v10  ;;  %v467_v54 = vmul.f32 %v1871_v34, %v1871_v34 }
  0x76   : > { %1026 = vmatpush.msra.mxu2 %v776_v58  ;;  %842 = vmatpush.msra.mxu0 %v775_v18  ;;  %v800_v48 = vld [vmem:[%s1705_s9 + $0x108] sm:$0xff]  ;;  %v398_v49 = vadd.f32 %v397_v42, %v1876_v35  ;;  %v427_v50 = vadd.f32 %v426_v44, %v1871_v34  ;;  %v1908_v53 = vld [vmem:[%s2505_s0 + $0xb0] sm:$0xff]  ;;  %v1922_v60 = vld [vmem:[%s2505_s0 + $0xc0] sm:$0xff]  ;;  %v466_v42 = vmul.f32 %v1858_v24, %v1858_v24 }
  0x77   : > { %1118 = vmatpush.msra.mxu3 %v808_v59  ;;  %934 = vmatpush.msra.mxu1 %v807_v22  ;;  %v1903_v52 = vld [vmem:[%s2505_s0 + $0xa8] sm:$0xff]  ;;  %v1917_v59 = vld [vmem:[%s2505_s0 + $0xb8] sm:$0xff]  ;;  %v1934_v5 = vld [vmem:[%s2505_s0 + $0xd0] sm:$0xff]  ;;  %v504_v32 = vadd.f32 %v503_v11, %v460_v8  ;;  %v468_v55 = vmul.f32 %v1876_v35, %v1876_v35  ;;  %v469_v8 = vmul.f32 %v1887_v45, %v1887_v45 }
  0x78   : > { %1027 = vmatpush.msra.mxu2 %v774_v16  ;;  %843 = vmatpush.msra.mxu0 %v773_v28  ;;  %v399_v57 = vadd.f32 %v398_v49, %v1892_v46  ;;  %v428_v58 = vadd.f32 %v427_v50, %v1887_v45  ;;  %v1929_v4 = vld [vmem:[%s2505_s0 + $0xc8] sm:$0xff]  ;;  %v1950_v18 = vld [vmem:[%s2505_s0 + $0xe0] sm:$0xff]  ;;  %v1966_v28 = vld [vmem:[%s2505_s0 + $0xf0] sm:$0xff]  ;;  %v470_v11 = vmul.f32 %v1892_v46, %v1892_v46 }
  0x79   : > { %1119 = vmatpush.msra.mxu3 %v806_v17  ;;  %935 = vmatpush.msra.mxu1 %v805_v33  ;;  %v1945_v17 = vld [vmem:[%s2505_s0 + $0xd8] sm:$0xff]  ;;  %2526 = vst [vmem:[#allocation4_spill] sm:$0xff] %v1950_v18  ;;  %v533_v33 = vadd.f32 %v532_v13, %v459_v7  ;;  %v505_v44 = vadd.f32 %v504_v32, %v462_v21  ;;  %v1993_v50 = vld [vmem:[%s2505_s0 + $0x108] sm:$0xff]  ;;  %v1998_v51 = vld [vmem:[%s2505_s0 + $0x110] sm:$0xff] }
  0x7a   : > { %1028 = vmatpush.msra.mxu2 %v772_v25  ;;  %v400_v61 = vadd.f32 %v399_v57, %v1908_v53  ;;  %v429_v1 = vadd.f32 %v428_v58, %v1903_v52  ;;  %2528 = vst [vmem:[#allocation6_spill] sm:$0xff] %v1966_v28  ;;  %v1977_v39 = vld [vmem:[%s2505_s0 + $0xf8] sm:$0xff]  ;;  %v2014_v7 = vld [vmem:[%s2505_s0 + $0x120] sm:$0xff]  ;;  %v2025_v21 = vld [vmem:[%s2505_s0 + $0x128] sm:$0xff] }
  0x7b   : > { %1120 = vmatpush.msra.mxu3 %v804_v27  ;;  %v1961_v27 = vld [vmem:[%s2505_s0 + $0xe8] sm:$0xff]  ;;  %2529 = vst [vmem:[#allocation7_spill] sm:$0xff] %v1977_v39  ;;  %v506_v56 = vadd.f32 %v505_v44, %v464_v30  ;;  %v474_v44 = vmul.f32 %v1922_v60, %v1922_v60 }
  0x7c   : > { %1029 = vmatpush.msra.mxu2 %v770_v40  ;;  %v401_v14 = vadd.f32 %v400_v61, %v1922_v60  ;;  %v430_v16 = vadd.f32 %v429_v1, %v1917_v59  ;;  %2527 = vst [vmem:[#allocation5_spill] sm:$0xff] %v1961_v27  ;;  %v1982_v40 = vld [vmem:[%s2505_s0 + $0x100] sm:$0xff]  ;;  %v2009_v1 = vld [vmem:[%s2505_s0 + $0x118] sm:$0xff] }
  0x7d   : > { %1121 = vmatpush.msra.mxu3 %v802_v41  ;;  %2530 = vst [vmem:[#allocation8_spill] sm:$0xff] %v1982_v40  ;;  %v465_v41 = vmul.f32 %v1853_v23, %v1853_v23  ;;  %v507_v13 = vadd.f32 %v506_v56, %v466_v42  ;;  %v473_v42 = vmul.f32 %v1917_v59, %v1917_v59  ;;  %v2062_v56 = vld [vmem:[%s2505_s0 + $0x150] sm:$0xff] }
  0x7e   : > { %1030 = vmatpush.msra.mxu2 %v768_v47  ;;  %v402_v22 = vadd.f32 %v401_v14, %v1934_v5  ;;  %v431_v25 = vadd.f32 %v430_v16, %v1929_v4  ;;  %v534_v47 = vadd.f32 %v533_v33, %v461_v20  ;;  %2531 = vst [vmem:[#allocation9_spill] sm:$0xff] %v1993_v50 }
  0x7f   : > { %1122 = vmatpush.msra.mxu3 %v800_v48  ;;  %2532 = vst [vmem:[#allocation10_spill] sm:$0xff] %v1998_v51  ;;  %v508_v30 = vadd.f32 %v507_v13, %v468_v55  ;;  %v2057_v55 = vld [vmem:[%s2505_s0 + $0x148] sm:$0xff] }
  0x80   : > { %v403_v36 = vadd.f32 %v402_v22, %v1950_v18  ;;  %v432_v37 = vadd.f32 %v431_v25, %v1945_v17  ;;  %v535_v57 = vadd.f32 %v534_v47, %v463_v29  ;;  %2533 = vst [vmem:[#allocation11_spill] sm:$0xff] %v2025_v21  ;;  %v2030_v22 = vld [vmem:[%s2505_s0 + $0x130] sm:$0xff]  ;;  %v471_v25 = vmul.f32 %v1903_v52, %v1903_v52 }
  0x81   : > { %2534 = vst [vmem:[#allocation12_spill] sm:$0xff] %v2030_v22  ;;  %v472_v29 = vmul.f32 %v1908_v53, %v1908_v53  ;;  %v509_v47 = vadd.f32 %v508_v30, %v470_v11 }
  0x82   : > { %v404_v48 = vadd.f32 %v403_v36, %v1966_v28  ;;  %v433_v49 = vadd.f32 %v432_v37, %v1961_v27  ;;  %v536_v14 = vadd.f32 %v535_v57, %v465_v41  ;;  %v2041_v37 = vld [vmem:[%s2505_s0 + $0x138] sm:$0xff]  ;;  %v2046_v41 = vld [vmem:[%s2505_s0 + $0x140] sm:$0xff]  ;;  %v475_v57 = vmul.f32 %v1929_v4, %v1929_v4 }
  0x84   : > { %v405_v58 = vadd.f32 %v404_v48, %v1982_v40  ;;  %v434_v61 = vadd.f32 %v433_v49, %v1977_v39  ;;  %v537_v32 = vadd.f32 %v536_v14, %v467_v54  ;;  %v2073_v14 = vld [vmem:[%s2505_s0 + $0x158] sm:$0xff] }
  0x85   : > { %2535 = vst [vmem:[#allocation13_spill] sm:$0xff] %v2073_v14 }
  0x86   : > { %v406_v16 = vadd.f32 %v405_v58, %v1998_v51  ;;  %v435_v20 = vadd.f32 %v434_v61, %v1993_v50  ;;  %v538_v48 = vadd.f32 %v537_v32, %v469_v8  ;;  %v476_v58 = vmul.f32 %v1934_v5, %v1934_v5 }
  0x87   : > { %v510_v61 = vadd.f32 %v509_v47, %v472_v29  ;;  %v2094_v47 = vld [vmem:[%s2505_s0 + $0x170] sm:$0xff] }
  0x88   : > { %v407_v33 = vadd.f32 %v406_v16, %v2014_v7  ;;  %v436_v36 = vadd.f32 %v435_v20, %v2009_v1  ;;  %v539_v8 = vadd.f32 %v538_v48, %v471_v25  ;;  %v2078_v16 = vld [vmem:[%s2505_s0 + $0x160] sm:$0xff]  ;;  %v477_v20 = vmul.f32 %v1945_v17, %v1945_v17  ;;  %2538 = vst [vmem:[#allocation16_spill] sm:$0xff] %v2094_v47 }
  0x89   : > { %2536 = vst [vmem:[#allocation14_spill] sm:$0xff] %v2078_v16  ;;  %v478_v25 = vmul.f32 %v1950_v18, %v1950_v18  ;;  %v511_v29 = vadd.f32 %v510_v61, %v474_v44  ;;  %v479_v48 = vmul.f32 %v1961_v27, %v1961_v27 }
  0x8a   : > { %v408_v49 = vadd.f32 %v407_v33, %v2030_v22  ;;  %v437_v54 = vadd.f32 %v436_v36, %v2025_v21  ;;  %v540_v30 = vadd.f32 %v539_v8, %v473_v42  ;;  %v2089_v36 = vld [vmem:[%s2505_s0 + $0x168] sm:$0xff]  ;;  %v480_v42 = vmul.f32 %v1966_v28, %v1966_v28  ;;  %v2105_v8 = vld [vmem:[%s2505_s0 + $0x178] sm:$0xff] }
  0x8b   : > { %2537 = vst [vmem:[#allocation15_spill] sm:$0xff] %v2089_v36  ;;  %v512_v44 = vadd.f32 %v511_v29, %v476_v58  ;;  %v483_v28 = vmul.f32 %v1993_v50, %v1993_v50 }
  0x8c   : > { %v409_v11 = vadd.f32 %v408_v49, %v2046_v41  ;;  %v438_v13 = vadd.f32 %v437_v54, %v2041_v37  ;;  %v541_v49 = vadd.f32 %v540_v30, %v475_v57  ;;  %2539 = vst [vmem:[#allocation17_spill] sm:$0xff] %v2105_v8  ;;  %v482_v57 = vmul.f32 %v1982_v40, %v1982_v40 }
  0x8d   : > { %v513_v58 = vadd.f32 %v512_v44, %v478_v25  ;;  %v485_v44 = vmul.f32 %v2009_v1, %v2009_v1 }
  0x8e   : > { %v410_v32 = vadd.f32 %v409_v11, %v2062_v56  ;;  %v439_v33 = vadd.f32 %v438_v13, %v2057_v55  ;;  %v2110_v11 = vld [vmem:[%s2505_s0 + $0x180] sm:$0xff]  ;;  %v481_v13 = vmul.f32 %v1977_v39, %v1977_v39  ;;  %v542_v29 = vadd.f32 %v541_v49, %v477_v20 }
  0x8f   : > { %2540 = vst [vmem:[#allocation18_spill] sm:$0xff] %v2110_v11  ;;  %v484_v39 = vmul.f32 %v1998_v51, %v1998_v51  ;;  %v514_v27 = vadd.f32 %v513_v58, %v480_v42  ;;  %v486_v49 = vmul.f32 %v2014_v7, %v2014_v7  ;;  %v487_v51 = vmul.f32 %v2025_v21, %v2025_v21 }
  0x90   : > { %v411_v54 = vadd.f32 %v410_v32, %v2078_v16  ;;  %v440_v61 = vadd.f32 %v439_v33, %v2073_v14  ;;  %v2121_v33 = vld [vmem:[%s2505_s0 + $0x188] sm:$0xff]  ;;  %v543_v18 = vadd.f32 %v542_v29, %v479_v48  ;;  %v488_v48 = vmul.f32 %v2030_v22, %v2030_v22 }
  0x91   : > { %v492_v21 = vmul.f32 %v2062_v56, %v2062_v56 }
  0x92   : > { %v412_v30 = vadd.f32 %v411_v54, %v2094_v47  ;;  %v441_v32 = vadd.f32 %v440_v61, %v2089_v36  ;;  %v515_v54 = vadd.f32 %v514_v27, %v482_v57  ;;  %v544_v61 = vadd.f32 %v543_v18, %v481_v13 }
  0x93   : > { %v490_v27 = vmul.f32 %v2046_v41, %v2046_v41  ;;  %v491_v57 = vmul.f32 %v2057_v55, %v2057_v55 }
  0x94   : > { %v413_v25 = vadd.f32 %v412_v30, %v2110_v11  ;;  %v442_v20 = vadd.f32 %v441_v32, %v2105_v8  ;;  %v516_v42 = vadd.f32 %v515_v54, %v484_v39  ;;  %v545_v58 = vadd.f32 %v544_v61, %v483_v28 }
  0x95   : > { %v489_v30 = vmul.f32 %v2041_v37, %v2041_v37  ;;  %v493_v28 = vmul.f32 %v2073_v14, %v2073_v14 }
  0x96   : > { %v414_v40 = vrot.slane %v413_v25, 4  ;;  %v443_v50 = vadd.f32 %v442_v20, %v2121_v33  ;;  %v517_v18 = vadd.f32 %v516_v42, %v486_v49  ;;  %v546_v13 = vadd.f32 %v545_v58, %v485_v44 }
  0x97   : > { %v495_v44 = vmul.f32 %v2089_v36, %v2089_v36 }
  0x98   : > { %v444_v29 = vrot.slane %v443_v50, 4  ;;  %v415_v32 = vadd.f32 %v414_v40, %v413_v25  ;;  %v518_v22 = vadd.f32 %v517_v18, %v488_v48  ;;  %v547_v39 = vadd.f32 %v546_v13, %v487_v51 }
  0x99   : > { %v494_v40 = vmul.f32 %v2078_v16, %v2078_v16  ;;  %v497_v51 = vmul.f32 %v2105_v8, %v2105_v8 }
  0x9a   : > { %v445_v20 = vadd.f32 %v444_v29, %v443_v50  ;;  %v416_v54 = vrot.slane %v415_v32, 2  ;;  %v519_v25 = vadd.f32 %v518_v22, %v490_v27  ;;  %v548_v61 = vadd.f32 %v547_v39, %v489_v30 }
  0x9b   : > { %v496_v50 = vmul.f32 %v2094_v47, %v2094_v47  ;;  %v498_v29 = vmul.f32 %v2110_v11, %v2110_v11  ;;  %v499_v30 = vmul.f32 %v2121_v33, %v2121_v33 }
  0x9c   : > { %v446_v49 = vrot.slane %v445_v20, 2  ;;  %v520_v42 = vadd.f32 %v519_v25, %v492_v21  ;;  %v549_v58 = vadd.f32 %v548_v61, %v491_v57  ;;  %v417_v48 = vadd.f32 %v416_v54, %v415_v32 }
  0x9e   : > { %v521_v18 = vadd.f32 %v520_v42, %v494_v40  ;;  %v550_v13 = vadd.f32 %v549_v58, %v493_v28  ;;  %v447_v22 = vadd.f32 %v446_v49, %v445_v20  ;;  %v418_v36 = vrot.slane %v417_v48, 1 }
  0xa0   : > { %v522_v27 = vadd.f32 %v521_v18, %v496_v50  ;;  %v551_v39 = vadd.f32 %v550_v13, %v495_v44  ;;  %v448_v21 = vrot.slane %v447_v22, 1  ;;  %v419_v61 = vadd.f32 %v418_v36, %v417_v48 }
  0xa2   : > { %v523_v16 = vadd.f32 %v522_v27, %v498_v29  ;;  %v552_v47 = vadd.f32 %v551_v39, %v497_v51  ;;  %v449_v54 = vadd.f32 %v448_v21, %v447_v22  ;;  %v560_v20 = vmul.f32 0.0051020407, %v419_v61  ;;  %v803_v27 = vld [vmem:[%s1705_s9 + $0x120] sm:$0xff] }
  0xa3   : > { %936 = vmatpush.msra.mxu1 %v803_v27  ;;  %v767_v61 = vld [vmem:[%s1705_s9] sm:$0xff] }
  0xa4   : > { %v524_v57 = vrot.slane %v523_v16, 4  ;;  %v553_v25 = vadd.f32 %v552_v47, %v499_v30  ;;  %v561_v58 = vmul.f32 0.0051020407, %v449_v54  ;;  %v564_v51 = vmul.f32 %v560_v20, %v560_v20  ;;  %v771_v30 = vld [vmem:[%s1705_s9 + $0x20] sm:$0xff] }
  0xa5   : > { %844 = vmatpush.msra.mxu0 %v771_v30 }
  0xa6   : > { %v525_v8 = vadd.f32 %v524_v57, %v523_v16  ;;  %v554_v32 = vrot.slane %v553_v25, 4  ;;  %v565_v47 = vmul.f32 %v561_v58, %v561_v58  ;;  %v769_v57 = vld [vmem:[%s1705_s9 + $0x10] sm:$0xff] }
  0xa7   : > { %845 = vmatpush.msra.mxu0 %v769_v57 }
  0xa8   : > { %v526_v14 = vrot.slane %v525_v8, 2  ;;  %v555_v11 = vadd.f32 %v554_v32, %v553_v25  ;;  %v801_v25 = vld [vmem:[%s1705_s9 + $0x110] sm:$0xff]  ;;  %v799_v32 = vld [vmem:[%s1705_s9 + $0x100] sm:$0xff] }
  0xa9   : > { %937 = vmatpush.msra.mxu1 %v801_v25  ;;  %846 = vmatpush.msra.mxu0 %v767_v61 }
  0xaa   : > { %v527_v40 = vadd.f32 %v526_v14, %v525_v8  ;;  %v556_v28 = vrot.slane %v555_v11, 2 }
  0xab   : > { %938 = vmatpush.msra.mxu1 %v799_v32 }
  0xac   : > { %v528_v49 = vrot.slane %v527_v40, 1  ;;  %v557_v42 = vadd.f32 %v556_v28, %v555_v11 }
  0xae   : > { %v529_v50 = vadd.f32 %v528_v49, %v527_v40  ;;  %v558_v44 = vrot.slane %v557_v42, 1 }
  0xb0   : > { %v559_v29 = vadd.f32 %v558_v44, %v557_v42  ;;  %v562_v18 = vmul.f32 0.0051020407, %v529_v50 }
  0xb2   : > { %v563_v36 = vmul.f32 0.0051020407, %v559_v29  ;;  %v566_v16 = vsub.f32 %v562_v18, %v564_v51  ;;  %v568_v18 = vld [vmem:[%s2506_s1] sm:$0x3] }
  0xb4   : > { %v567_v48 = vsub.f32 %v563_v36, %v565_v47  ;;  %v569_v14 = vadd.f32 1e-05, %v566_v16 }
  0xb6   : > { %v570_v8 = vadd.f32 1e-05, %v567_v48  ;;  %1470 = vrsqrt.f32 %v569_v14  ;;  %vm577_vm0 = vweird.f32 %v569_v14 }
  0xb8   : > { %1472 = vrsqrt.f32 %v570_v8  ;;  %vm587_vm2 = vweird.f32 %v570_v8 }
  0xbc   : > { %v1471_v11 = vpop.eup %1470 }
  0xbd   : > { %v572_v13 = vmul.f32 %v1471_v11, %v569_v14  ;;  %vm578_vm1 = vweird.f32 %v1471_v11 }
  0xbe   : > { %v1473_v22 = vpop.eup %1472  ;;  %vm579_vm4 = vmor %vm577_vm0, %vm578_vm1 }
  0xbf   : > { %v573_v39 = vmul.f32 %v1471_v11, %v572_v13  ;;  %v582_v21 = vmul.f32 %v1473_v22, %v570_v8  ;;  %vm588_vm3 = vweird.f32 %v1473_v22 }
  0xc0   : > { %vm589_vm5 = vmor %vm587_vm2, %vm588_vm3 }
  0xc1   : > { %v574_v54 = vmul.f32 0.5, %v573_v39  ;;  %v583_v40 = vmul.f32 %v1473_v22, %v582_v21 }
  0xc3   : > { %v575_v28 = vsub.f32 1.5, %v574_v54  ;;  %v584_v49 = vmul.f32 0.5, %v583_v40 }
  0xc5   : > { %v576_v42 = vmul.f32 %v1471_v11, %v575_v28  ;;  %v585_v50 = vsub.f32 1.5, %v584_v49 }
  0xc7   : > { %v586_v44 = vmul.f32 %v1473_v22, %v585_v50  ;;  %v580_v51 = vsel %vm579_vm4, %v1471_v11, %v576_v42  ;;  %v598_v11 = vld [vmem:[%s2507_s2] sm:$0x3] }
  0xc9   : > { %v590_v29 = vsel %vm589_vm5, %v1473_v22, %v586_v44 }
  0xca   : > { %v593_v47 = vrot.slane %v590_v29, 7 }
  0xcc   : > { %v595_v36 = vsel %vm594_vm6, %v580_v51, %v593_v47 }
  0xcd   : > { %v597_v16 = vmul.f32 %v595_v36, %v568_v18 }
  0xcf   : > { %v2169_v48 = vperm.slane %v597_v16, 0  ;;  %v2171_v14 = vperm.slane %v597_v16, 1 }
  0xd1   : > { %v604_v8 = vmul.f32 %v2169_v48, %v560_v20  ;;  %v605_v13 = vmul.f32 %v2171_v14, %v561_v58  ;;  %v612_v39 = vmul.f32 %v2169_v48, %v1703_v0  ;;  %v613_v21 = vmul.f32 %v2171_v14, %v1725_v12 }
  0xd2   : > { %v614_v61 = vmul.f32 %v2169_v48, %v1715_v6  ;;  %v615_v32 = vmul.f32 %v2171_v14, %v1732_v15  ;;  %v616_v42 = vmul.f32 %v2169_v48, %v1741_v19  ;;  %v617_v6 = vmul.f32 %v2171_v14, %v1752_v26 }
  0xd3   : > { %v608_v22 = vrot.slane %v605_v13, 7  ;;  %v618_v29 = vmul.f32 %v2169_v48, %v1762_v31  ;;  %v619_v18 = vmul.f32 %v2171_v14, %v1773_v38  ;;  %v620_v16 = vmul.f32 %v2169_v48, %v1782_v43 }
  0xd5   : > { %v609_v30 = vsel %vm594_vm6, %v604_v8, %v608_v22  ;;  %v621_v8 = vmul.f32 %v2171_v14, %v1807_v62  ;;  %v622_v22 = vmul.f32 %v2169_v48, %v1812_v63 }
  0xd6   : > { %v611_v27 = vsub.f32 %v598_v11, %v609_v30  ;;  %v623_v30 = vmul.f32 %v2171_v14, %v1818_v2 }
  0xd8   : > { %v2182_v57 = vperm.slane %v611_v27, 0  ;;  %v2184_v25 = vperm.slane %v611_v27, 1 }
  0xda   : > { %v667_v20 = vadd.f32 %v2182_v57, %v612_v39  ;;  %v668_v58 = vadd.f32 %v2184_v25, %v613_v21  ;;  %v669_v0 = vadd.f32 %v2182_v57, %v614_v61  ;;  %v670_v12 = vadd.f32 %v2184_v25, %v615_v32 }
  0xdb   : > { %v671_v15 = vadd.f32 %v2182_v57, %v616_v42  ;;  %v672_v50 = vadd.f32 %v2184_v25, %v617_v6  ;;  %v673_v19 = vadd.f32 %v2182_v57, %v618_v29  ;;  %v674_v26 = vadd.f32 %v2184_v25, %v619_v18 }
  0xdc   : > { %v717_v54 = vmax.f32 %v667_v20, 0.0  ;;  %v718_v40 = vmax.f32 %v668_v58, 0.0  ;;  %v719_v28 = vmax.f32 %v669_v0, 0.0  ;;  %v720_v49 = vmax.f32 %v670_v12, 0.0 }
  0xdd   : > { %v721_v44 = vmax.f32 %v671_v15, 0.0  ;;  %v722_v51 = vmax.f32 %v672_v50, 0.0  ;;  %v723_v47 = vmax.f32 %v673_v19, 0.0  ;;  %v724_v36 = vmax.f32 %v674_v26, 0.0 }
  0xde   : > { %1031 = vmatmul.f32.vlgmr.msra.gmra.mxu2 %v717_v54  ;;  %1123 = vmatmul.f32.vlgmr.msra.gmra.mxu3 %v718_v40  ;;  %v675_v31 = vadd.f32 %v2182_v57, %v620_v16  ;;  %v676_v38 = vadd.f32 %v2184_v25, %v621_v8  ;;  %v677_v43 = vadd.f32 %v2182_v57, %v622_v22 }
  0xdf   : > { %847 = vmatmul.f32.vlgmr.msra.gmra.mxu0 %v717_v54  ;;  %939 = vmatmul.f32.vlgmr.msra.gmra.mxu1 %v718_v40  ;;  %v678_v62 = vadd.f32 %v2184_v25, %v623_v30  ;;  %v624_v21 = vmul.f32 %v2169_v48, %v1823_v3  ;;  %v625_v20 = vmul.f32 %v2171_v14, %v1833_v9 }
  0xe0   : > { %v725_v13 = vmax.f32 %v675_v31, 0.0  ;;  %v726_v11 = vmax.f32 %v676_v38, 0.0  ;;  %v727_v27 = vmax.f32 %v677_v43, 0.0  ;;  %v626_v32 = vmul.f32 %v2169_v48, %v1838_v10 }
  0xe1   : > { %v728_v39 = vmax.f32 %v678_v62, 0.0  ;;  %v679_v63 = vadd.f32 %v2182_v57, %v624_v21  ;;  %v680_v2 = vadd.f32 %v2184_v25, %v625_v20  ;;  %v627_v54 = vmul.f32 %v2171_v14, %v1853_v23  ;;  %v2541_v62 = vld [vmem:[#allocation4_spill] sm:$0xff] }
  0xe2   : > { %v681_v3 = vadd.f32 %v2182_v57, %v626_v32  ;;  %v628_v12 = vmul.f32 %v2169_v48, %v1858_v24  ;;  %v630_v6 = vmul.f32 %v2169_v48, %v1876_v35  ;;  %v631_v15 = vmul.f32 %v2171_v14, %v1887_v45 }
  0xe3   : > { %v729_v58 = vmax.f32 %v679_v63, 0.0  ;;  %v730_v61 = vmax.f32 %v680_v2, 0.0  ;;  %v682_v9 = vadd.f32 %v2184_v25, %v627_v54  ;;  %v633_v29 = vmul.f32 %v2171_v14, %v1903_v52  ;;  %v2543_v2 = vld [vmem:[#allocation6_spill] sm:$0xff] }
  0xe4   : > { %v731_v40 = vmax.f32 %v681_v3, 0.0  ;;  %v683_v10 = vadd.f32 %v2182_v57, %v628_v12  ;;  %v685_v24 = vadd.f32 %v2182_v57, %v630_v6  ;;  %v634_v26 = vmul.f32 %v2169_v48, %v1908_v53 }
  0xe5   : > { %v732_v0 = vmax.f32 %v682_v9, 0.0  ;;  %v688_v45 = vadd.f32 %v2184_v25, %v633_v29  ;;  %v636_v8 = vmul.f32 %v2169_v48, %v1922_v60  ;;  %v637_v31 = vmul.f32 %v2171_v14, %v1929_v4 }
  0xe6   : > { %1034 = vmatmul.f32.gmra.mxu2 %v719_v28  ;;  %1126 = vmatmul.f32.gmra.mxu3 %v720_v49  ;;  %v735_v50 = vmax.f32 %v685_v24, 0.0  ;;  %v639_v22 = vmul.f32 %v2171_v14, %v1945_v17 }
  0xe7   : > { %850 = vmatmul.f32.gmra.mxu0 %v719_v28  ;;  %942 = vmatmul.f32.gmra.mxu1 %v720_v49  ;;  %v629_v28 = vmul.f32 %v2171_v14, %v1871_v34  ;;  %v733_v49 = vmax.f32 %v683_v10, 0.0  ;;  %v686_v34 = vadd.f32 %v2184_v25, %v631_v15  ;;  %v738_v19 = vmax.f32 %v688_v45, 0.0 }
  0xe8   : > { %v691_v53 = vadd.f32 %v2182_v57, %v636_v8  ;;  %v694_v4 = vadd.f32 %v2184_v25, %v639_v22 }
  0xe9   : > { %v684_v23 = vadd.f32 %v2184_v25, %v629_v28  ;;  %v2546_v28 = vld [vmem:[#allocation9_spill] sm:$0xff] }
  0xea   : > { %v741_v38 = vmax.f32 %v691_v53, 0.0  ;;  %v744_v43 = vmax.f32 %v694_v4, 0.0  ;;  %v645_v10 = vmul.f32 %v2171_v14, %v2546_v28  ;;  %v651_v4 = vmul.f32 %v2171_v14, %v2041_v37  ;;  %v2550_v28 = vld [vmem:[#allocation13_spill] sm:$0xff] }
  0xeb   : > { %v734_v42 = vmax.f32 %v684_v23, 0.0 }
  0xee   : > { %1037 = vmatmul.f32.gmra.mxu2 %v721_v44  ;;  %1129 = vmatmul.f32.gmra.mxu3 %v722_v51 }
  0xef   : > { %853 = vmatmul.f32.gmra.mxu0 %v721_v44  ;;  %945 = vmatmul.f32.gmra.mxu1 %v722_v51  ;;  %v736_v44 = vmax.f32 %v686_v34, 0.0  ;;  %v632_v51 = vmul.f32 %v2169_v48, %v1892_v46  ;;  %v689_v46 = vadd.f32 %v2182_v57, %v634_v26  ;;  %v647_v34 = vmul.f32 %v2171_v14, %v2009_v1 }
  0xf1   : > { %v687_v35 = vadd.f32 %v2182_v57, %v632_v51 }
  0xf3   : > { %v737_v18 = vmax.f32 %v687_v35, 0.0  ;;  %v702_v35 = vadd.f32 %v2184_v25, %v647_v34 }
  0xf5   : > { %v752_v26 = vmax.f32 %v702_v35, 0.0  ;;  %v2552_v35 = vld [vmem:[#allocation15_spill] sm:$0xff] }
  0xf6   : > { %1040 = vmatmul.f32.gmra.mxu2 %v723_v47  ;;  %1132 = vmatmul.f32.gmra.mxu3 %v724_v36 }
  0xf7   : > { %856 = vmatmul.f32.gmra.mxu0 %v723_v47  ;;  %948 = vmatmul.f32.gmra.mxu1 %v724_v36  ;;  %v635_v47 = vmul.f32 %v2171_v14, %v1917_v59  ;;  %v739_v36 = vmax.f32 %v689_v46, 0.0  ;;  %v692_v59 = vadd.f32 %v2184_v25, %v637_v31  ;;  %v2548_v46 = vld [vmem:[#allocation11_spill] sm:$0xff] }
  0xf9   : > { %v690_v52 = vadd.f32 %v2184_v25, %v635_v47  ;;  %v648_v47 = vmul.f32 %v2169_v48, %v2014_v7 }
  0xfb   : > { %v740_v16 = vmax.f32 %v690_v52, 0.0  ;;  %v649_v52 = vmul.f32 %v2171_v14, %v2548_v46  ;;  %v703_v31 = vadd.f32 %v2182_v57, %v648_v47 }
  0xfd   : > { %v704_v53 = vadd.f32 %v2184_v25, %v649_v52  ;;  %v753_v22 = vmax.f32 %v703_v31, 0.0 }
  0xfe   : > { %1043 = vmatmul.f32.gmra.mxu2 %v725_v13  ;;  %1135 = vmatmul.f32.gmra.mxu3 %v726_v11 }
  0xff   : > { %859 = vmatmul.f32.gmra.mxu0 %v725_v13  ;;  %951 = vmatmul.f32.gmra.mxu1 %v726_v11  ;;  %v742_v13 = vmax.f32 %v692_v59, 0.0  ;;  %v638_v11 = vmul.f32 %v2169_v48, %v1934_v5 }
 0x101   : > { %v693_v60 = vadd.f32 %v2182_v57, %v638_v11 }
 0x103   : > { %v743_v30 = vmax.f32 %v693_v60, 0.0  ;;  %v754_v60 = vmax.f32 %v704_v53, 0.0 }
 0x106   : > { %1046 = vmatmul.f32.gmra.mxu2 %v727_v27  ;;  %1138 = vmatmul.f32.gmra.mxu3 %v728_v39 }
 0x107   : > { %862 = vmatmul.f32.gmra.mxu0 %v727_v27  ;;  %954 = vmatmul.f32.gmra.mxu1 %v728_v39  ;;  %v640_v27 = vmul.f32 %v2169_v48, %v2541_v62  ;;  %v2542_v39 = vld [vmem:[#allocation5_spill] sm:$0xff] }
 0x108   : > { %v641_v21 = vmul.f32 %v2171_v14, %v2542_v39  ;;  %v706_v39 = vadd.f32 %v2184_v25, %v651_v4 }
 0x109   : > { %v695_v5 = vadd.f32 %v2182_v57, %v640_v27 }
 0x10a   : > { %v696_v17 = vadd.f32 %v2184_v25, %v641_v21  ;;  %v756_v37 = vmax.f32 %v706_v39, 0.0  ;;  %v2555_v39 = vld [vmem:[#allocation18_spill] sm:$0xff] }
 0x10b   : > { %v745_v20 = vmax.f32 %v695_v5, 0.0 }
 0x10c   : > { %v746_v63 = vmax.f32 %v696_v17, 0.0 }
 0x10e   : > { %1049 = vmatmul.f32.gmra.mxu2 %v729_v58  ;;  %1141 = vmatmul.f32.gmra.mxu3 %v730_v61 }
 0x10f   : > { %865 = vmatmul.f32.gmra.mxu0 %v729_v58  ;;  %957 = vmatmul.f32.gmra.mxu1 %v730_v61  ;;  %v642_v58 = vmul.f32 %v2169_v48, %v2543_v2  ;;  %v2544_v61 = vld [vmem:[#allocation7_spill] sm:$0xff]  ;;  %v653_v2 = vmul.f32 %v2171_v14, %v2057_v55  ;;  %v654_v55 = vmul.f32 %v2169_v48, %v2062_v56 }
 0x110   : > { %v643_v32 = vmul.f32 %v2171_v14, %v2544_v61 }
 0x111   : > { %v697_v54 = vadd.f32 %v2182_v57, %v642_v58 }
 0x112   : > { %v698_v3 = vadd.f32 %v2184_v25, %v643_v32 }
 0x113   : > { %v747_v9 = vmax.f32 %v697_v54, 0.0 }
 0x116   : > { %1052 = vmatmul.f32.gmra.mxu2 %v731_v40  ;;  %1144 = vmatmul.f32.gmra.mxu3 %v732_v0 }
 0x117   : > { %868 = vmatmul.f32.gmra.mxu0 %v731_v40  ;;  %960 = vmatmul.f32.gmra.mxu1 %v732_v0  ;;  %v748_v40 = vmax.f32 %v698_v3, 0.0  ;;  %v2545_v0 = vld [vmem:[#allocation8_spill] sm:$0xff]  ;;  %v708_v3 = vadd.f32 %v2184_v25, %v653_v2 }
 0x118   : > { %v644_v12 = vmul.f32 %v2169_v48, %v2545_v0 }
 0x11a   : > { %v699_v23 = vadd.f32 %v2182_v57, %v644_v12  ;;  %v758_v12 = vmax.f32 %v708_v3, 0.0 }
 0x11c   : > { %v749_v15 = vmax.f32 %v699_v23, 0.0 }
 0x11e   : > { %1055 = vmatmul.f32.gmra.mxu2 %v733_v49  ;;  %1147 = vmatmul.f32.gmra.mxu3 %v734_v42 }
 0x11f   : > { %871 = vmatmul.f32.gmra.mxu0 %v733_v49  ;;  %963 = vmatmul.f32.gmra.mxu1 %v734_v42  ;;  %v700_v49 = vadd.f32 %v2184_v25, %v645_v10  ;;  %v2547_v42 = vld [vmem:[#allocation10_spill] sm:$0xff]  ;;  %v655_v10 = vmul.f32 %v2171_v14, %v2550_v28 }
 0x120   : > { %v646_v6 = vmul.f32 %v2169_v48, %v2547_v42 }
 0x121   : > { %v750_v24 = vmax.f32 %v700_v49, 0.0 }
 0x122   : > { %v701_v29 = vadd.f32 %v2182_v57, %v646_v6  ;;  %v709_v6 = vadd.f32 %v2182_v57, %v654_v55 }
 0x124   : > { %v751_v1 = vmax.f32 %v701_v29, 0.0  ;;  %v759_v34 = vmax.f32 %v709_v6, 0.0 }
 0x126   : > { %1058 = vmatmul.f32.gmra.mxu2 %v735_v50  ;;  %1150 = vmatmul.f32.gmra.mxu3 %v736_v44 }
 0x127   : > { %874 = vmatmul.f32.gmra.mxu0 %v735_v50  ;;  %966 = vmatmul.f32.gmra.mxu1 %v736_v44 }
 0x12e   : > { %1061 = vmatmul.f32.gmra.mxu2 %v737_v18  ;;  %1153 = vmatmul.f32.gmra.mxu3 %v738_v19 }
 0x12f   : > { %877 = vmatmul.f32.gmra.mxu0 %v737_v18  ;;  %969 = vmatmul.f32.gmra.mxu1 %v738_v19 }
 0x136   : > { %1064 = vmatmul.f32.gmra.mxu2 %v739_v36  ;;  %1156 = vmatmul.f32.gmra.mxu3 %v740_v16 }
 0x137   : > { %880 = vmatmul.f32.gmra.mxu0 %v739_v36  ;;  %972 = vmatmul.f32.gmra.mxu1 %v740_v16 }
 0x13e   : > { %1067 = vmatmul.f32.gmra.mxu2 %v741_v38  ;;  %1159 = vmatmul.f32.gmra.mxu3 %v742_v13 }
 0x13f   : > { %883 = vmatmul.f32.gmra.mxu0 %v741_v38  ;;  %975 = vmatmul.f32.gmra.mxu1 %v742_v13  ;;  %v2549_v38 = vld [vmem:[#allocation12_spill] sm:$0xff] }
 0x140   : > { %v650_v13 = vmul.f32 %v2169_v48, %v2549_v38 }
 0x142   : > { %v705_v27 = vadd.f32 %v2182_v57, %v650_v13 }
 0x144   : > { %v755_v17 = vmax.f32 %v705_v27, 0.0 }
 0x146   : > { %1070 = vmatmul.f32.gmra.mxu2 %v743_v30  ;;  %1162 = vmatmul.f32.gmra.mxu3 %v744_v43 }
 0x147   : > { %886 = vmatmul.f32.gmra.mxu0 %v743_v30  ;;  %978 = vmatmul.f32.gmra.mxu1 %v744_v43 }
 0x14e   : > { %1073 = vmatmul.f32.gmra.mxu2 %v745_v20  ;;  %1165 = vmatmul.f32.gmra.mxu3 %v746_v63 }
 0x14f   : > { %889 = vmatmul.f32.gmra.mxu0 %v745_v20  ;;  %981 = vmatmul.f32.gmra.mxu1 %v746_v63  ;;  %v652_v63 = vmul.f32 %v2169_v48, %v2046_v41 }
 0x151   : > { %v707_v54 = vadd.f32 %v2182_v57, %v652_v63 }
 0x153   : > { %v757_v0 = vmax.f32 %v707_v54, 0.0 }
 0x156   : > { %1076 = vmatmul.f32.gmra.mxu2 %v747_v9  ;;  %1168 = vmatmul.f32.gmra.mxu3 %v748_v40 }
 0x157   : > { %892 = vmatmul.f32.gmra.mxu0 %v747_v9  ;;  %984 = vmatmul.f32.gmra.mxu1 %v748_v40 }
 0x15c   : > { %v848_v50 = vpop.f32.mrf.mxu0  ;;  %v940_v44 = vpop.f32.mrf.mxu1 }
 0x15d   : > { %v941_v51 = vadd.f32 %v940_v44, %v848_v50 }
 0x15e   : > { %1079 = vmatmul.f32.gmra.mxu2 %v749_v15  ;;  %1171 = vmatmul.f32.gmra.mxu3 %v750_v24 }
 0x15f   : > { %1199 = vst [vmem:[%s2292_s10] sm:$0xff] %v941_v51  ;;  %895 = vmatmul.f32.gmra.mxu0 %v749_v15  ;;  %987 = vmatmul.f32.gmra.mxu1 %v750_v24  ;;  %v710_v15 = vadd.f32 %v2184_v25, %v655_v10  ;;  %v2551_v51 = vld [vmem:[#allocation14_spill] sm:$0xff] }
 0x160   : > { %v656_v29 = vmul.f32 %v2169_v48, %v2551_v51 }
 0x161   : > { %v1032_v45 = vpop.f32.mrf.mxu2  ;;  %v1124_v18 = vpop.f32.mrf.mxu3  ;;  %v760_v44 = vmax.f32 %v710_v15, 0.0 }
 0x162   : > { %v1125_v19 = vadd.f32 %v1124_v18, %v1032_v45  ;;  %v657_v45 = vmul.f32 %v2171_v14, %v2552_v35 }
 0x164   : > { %1200 = vst [vmem:[%s2292_s10 + $0x8] sm:$0xff] %v1125_v19  ;;  %v851_v36 = vpop.f32.mrf.mxu0  ;;  %v943_v16 = vpop.f32.mrf.mxu1  ;;  %v712_v47 = vadd.f32 %v2184_v25, %v657_v45 }
 0x165   : > { %v944_v8 = vadd.f32 %v943_v16, %v851_v36  ;;  %v2553_v36 = vld [vmem:[#allocation16_spill] sm:$0xff] }
 0x166   : > { %1082 = vmatmul.f32.gmra.mxu2 %v751_v1  ;;  %1174 = vmatmul.f32.gmra.mxu3 %v752_v26  ;;  %v658_v16 = vmul.f32 %v2169_v48, %v2553_v36  ;;  %v762_v53 = vmax.f32 %v712_v47, 0.0 }
 0x167   : > { %1201 = vst [vmem:[%s2292_s10 + $0x10] sm:$0xff] %v944_v8  ;;  %898 = vmatmul.f32.gmra.mxu0 %v751_v1  ;;  %990 = vmatmul.f32.gmra.mxu1 %v752_v26  ;;  %v711_v26 = vadd.f32 %v2182_v57, %v656_v29 }
 0x169   : > { %v1035_v59 = vpop.f32.mrf.mxu2  ;;  %v1127_v7 = vpop.f32.mrf.mxu3  ;;  %v761_v31 = vmax.f32 %v711_v26, 0.0 }
 0x16a   : > { %v1128_v11 = vadd.f32 %v1127_v7, %v1035_v59  ;;  %v2554_v59 = vld [vmem:[#allocation17_spill] sm:$0xff] }
 0x16b   : > { %v659_v7 = vmul.f32 %v2171_v14, %v2554_v59 }
 0x16c   : > { %1202 = vst [vmem:[%s2292_s10 + $0x18] sm:$0xff] %v1128_v11  ;;  %v854_v30 = vpop.f32.mrf.mxu0  ;;  %v946_v43 = vpop.f32.mrf.mxu1 }
 0x16d   : > { %v947_v62 = vadd.f32 %v946_v43, %v854_v30 }
 0x16e   : > { %1085 = vmatmul.f32.gmra.mxu2 %v753_v22  ;;  %1177 = vmatmul.f32.gmra.mxu3 %v754_v60 }
 0x16f   : > { %1203 = vst [vmem:[%s2292_s10 + $0x20] sm:$0xff] %v947_v62  ;;  %901 = vmatmul.f32.gmra.mxu0 %v753_v22  ;;  %993 = vmatmul.f32.gmra.mxu1 %v754_v60  ;;  %v713_v22 = vadd.f32 %v2182_v57, %v658_v16  ;;  %v714_v60 = vadd.f32 %v2184_v25, %v659_v7 }
 0x171   : > { %v1038_v21 = vpop.f32.mrf.mxu2  ;;  %v1130_v5 = vpop.f32.mrf.mxu3  ;;  %v763_v43 = vmax.f32 %v713_v22, 0.0  ;;  %v764_v27 = vmax.f32 %v714_v60, 0.0 }
 0x172   : > { %v1131_v20 = vadd.f32 %v1130_v5, %v1038_v21  ;;  %v660_v21 = vmul.f32 %v2169_v48, %v2555_v39  ;;  %v661_v5 = vmul.f32 %v2171_v14, %v2121_v33 }
 0x174   : > { %1204 = vst [vmem:[%s2292_s10 + $0x28] sm:$0xff] %v1131_v20  ;;  %v857_v58 = vpop.f32.mrf.mxu0  ;;  %v949_v61 = vpop.f32.mrf.mxu1  ;;  %v715_v63 = vadd.f32 %v2182_v57, %v660_v21  ;;  %v716_v2 = vadd.f32 %v2184_v25, %v661_v5 }
 0x175   : > { %v950_v32 = vadd.f32 %v949_v61, %v857_v58 }
 0x176   : > { %1088 = vmatmul.f32.gmra.mxu2 %v755_v17  ;;  %1180 = vmatmul.f32.gmra.mxu3 %v756_v37  ;;  %v765_v33 = vmax.f32 %v715_v63, 0.0  ;;  %v766_v14 = vmax.f32 %v716_v2, 0.0 }
 0x177   : > { %1205 = vst [vmem:[%s2292_s10 + $0x30] sm:$0xff] %v950_v32  ;;  %904 = vmatmul.f32.gmra.mxu0 %v755_v17  ;;  %996 = vmatmul.f32.gmra.mxu1 %v756_v37 }
 0x179   : > { %v1041_v9 = vpop.f32.mrf.mxu2  ;;  %v1133_v41 = vpop.f32.mrf.mxu3 }
 0x17a   : > { %v1134_v40 = vadd.f32 %v1133_v41, %v1041_v9 }
 0x17c   : > { %1206 = vst [vmem:[%s2292_s10 + $0x38] sm:$0xff] %v1134_v40  ;;  %v860_v23 = vpop.f32.mrf.mxu0  ;;  %v952_v49 = vpop.f32.mrf.mxu1 }
 0x17d   : > { %v953_v42 = vadd.f32 %v952_v49, %v860_v23 }
 0x17e   : > { %1091 = vmatmul.f32.gmra.mxu2 %v757_v0  ;;  %1183 = vmatmul.f32.gmra.mxu3 %v758_v12 }
 0x17f   : > { %1207 = vst [vmem:[%s2292_s10 + $0x40] sm:$0xff] %v953_v42  ;;  %907 = vmatmul.f32.gmra.mxu0 %v757_v0  ;;  %999 = vmatmul.f32.gmra.mxu1 %v758_v12 }
 0x181   : > { %v1044_v56 = vpop.f32.mrf.mxu2  ;;  %v1136_v24 = vpop.f32.mrf.mxu3 }
 0x182   : > { %v1137_v50 = vadd.f32 %v1136_v24, %v1044_v56 }
 0x184   : > { %1208 = vst [vmem:[%s2292_s10 + $0x48] sm:$0xff] %v1137_v50  ;;  %v863_v18 = vpop.f32.mrf.mxu0  ;;  %v955_v1 = vpop.f32.mrf.mxu1 }
 0x185   : > { %v956_v19 = vadd.f32 %v955_v1, %v863_v18 }
 0x186   : > { %1094 = vmatmul.f32.gmra.mxu2 %v759_v34  ;;  %1186 = vmatmul.f32.gmra.mxu3 %v760_v44 }
 0x187   : > { %1209 = vst [vmem:[%s2292_s10 + $0x50] sm:$0xff] %v956_v19  ;;  %910 = vmatmul.f32.gmra.mxu0 %v759_v34  ;;  %1002 = vmatmul.f32.gmra.mxu1 %v760_v44 }
 0x189   : > { %v1047_v46 = vpop.f32.mrf.mxu2  ;;  %v1139_v52 = vpop.f32.mrf.mxu3 }
 0x18a   : > { %v1140_v8 = vadd.f32 %v1139_v52, %v1047_v46 }
 0x18c   : > { %1210 = vst [vmem:[%s2292_s10 + $0x58] sm:$0xff] %v1140_v8  ;;  %v866_v38 = vpop.f32.mrf.mxu0  ;;  %v958_v13 = vpop.f32.mrf.mxu1 }
 0x18d   : > { %v959_v11 = vadd.f32 %v958_v13, %v866_v38 }
 0x18e   : > { %1097 = vmatmul.f32.gmra.mxu2 %v761_v31  ;;  %1189 = vmatmul.f32.gmra.mxu3 %v762_v53 }
 0x18f   : > { %1211 = vst [vmem:[%s2292_s10 + $0x60] sm:$0xff] %v959_v11  ;;  %913 = vmatmul.f32.gmra.mxu0 %v761_v31  ;;  %1005 = vmatmul.f32.gmra.mxu1 %v762_v53 }
 0x191   : > { %v1050_v4 = vpop.f32.mrf.mxu2  ;;  %v1142_v30 = vpop.f32.mrf.mxu3 }
 0x192   : > { %v1143_v62 = vadd.f32 %v1142_v30, %v1050_v4 }
 0x194   : > { %1212 = vst [vmem:[%s2292_s10 + $0x68] sm:$0xff] %v1143_v62  ;;  %v869_v17 = vpop.f32.mrf.mxu0  ;;  %v961_v20 = vpop.f32.mrf.mxu1 }
 0x195   : > { %v962_v37 = vadd.f32 %v961_v20, %v869_v17 }
 0x196   : > { %1100 = vmatmul.f32.gmra.mxu2 %v763_v43  ;;  %1192 = vmatmul.f32.gmra.mxu3 %v764_v27 }
 0x197   : > { %1213 = vst [vmem:[%s2292_s10 + $0x70] sm:$0xff] %v962_v37  ;;  %916 = vmatmul.f32.gmra.mxu0 %v763_v43  ;;  %1008 = vmatmul.f32.gmra.mxu1 %v764_v27 }
 0x199   : > { %v1053_v58 = vpop.f32.mrf.mxu2  ;;  %v1145_v48 = vpop.f32.mrf.mxu3 }
 0x19a   : > { %v1146_v61 = vadd.f32 %v1145_v48, %v1053_v58 }
 0x19c   : > { %1214 = vst [vmem:[%s2292_s10 + $0x78] sm:$0xff] %v1146_v61  ;;  %v872_v32 = vpop.f32.mrf.mxu0  ;;  %v964_v54 = vpop.f32.mrf.mxu1 }
 0x19d   : > { %v965_v3 = vadd.f32 %v964_v54, %v872_v32 }
 0x19e   : > { %1103 = vmatmul.f32.gmra.mxu2 %v765_v33  ;;  %1195 = vmatmul.f32.gmra.mxu3 %v766_v14 }
 0x19f   : > { %1215 = vst [vmem:[%s2292_s10 + $0x80] sm:$0xff] %v965_v3  ;;  %919 = vmatmul.f32.gmra.mxu0 %v765_v33  ;;  %1011 = vmatmul.f32.gmra.mxu1 %v766_v14 }
 0x1a1   : > { %v1056_v57 = vpop.f32.mrf.mxu2  ;;  %v1148_v25 = vpop.f32.mrf.mxu3 }
 0x1a2   : > { %v1149_v9 = vadd.f32 %v1148_v25, %v1056_v57 }
 0x1a4   : > { %1216 = vst [vmem:[%s2292_s10 + $0x88] sm:$0xff] %v1149_v9  ;;  %v875_v41 = vpop.f32.mrf.mxu0  ;;  %v967_v55 = vpop.f32.mrf.mxu1 }
 0x1a5   : > { %v968_v40 = vadd.f32 %v967_v55, %v875_v41 }
 0x1a7   : > { %1217 = vst [vmem:[%s2292_s10 + $0x90] sm:$0xff] %v968_v40 }
 0x1a9   : > { %v1059_v0 = vpop.f32.mrf.mxu2  ;;  %v1151_v12 = vpop.f32.mrf.mxu3 }
 0x1aa   : > { %v1152_v28 = vadd.f32 %v1151_v12, %v1059_v0 }
 0x1ac   : > { %1218 = vst [vmem:[%s2292_s10 + $0x98] sm:$0xff] %v1152_v28  ;;  %v878_v10 = vpop.f32.mrf.mxu0  ;;  %v970_v23 = vpop.f32.mrf.mxu1 }
 0x1ad   : > { %v971_v49 = vadd.f32 %v970_v23, %v878_v10 }
 0x1af   : > { %1219 = vst [vmem:[%s2292_s10 + $0xa0] sm:$0xff] %v971_v49 }
 0x1b1   : > { %v1062_v42 = vpop.f32.mrf.mxu2  ;;  %v1154_v6 = vpop.f32.mrf.mxu3 }
 0x1b2   : > { %v1155_v15 = vadd.f32 %v1154_v6, %v1062_v42 }
 0x1b4   : > { %1220 = vst [vmem:[%s2292_s10 + $0xa8] sm:$0xff] %v1155_v15  ;;  %v881_v56 = vpop.f32.mrf.mxu0  ;;  %v973_v24 = vpop.f32.mrf.mxu1 }
 0x1b5   : > { %v974_v34 = vadd.f32 %v973_v24, %v881_v56 }
 0x1b7   : > { %1221 = vst [vmem:[%s2292_s10 + $0xb0] sm:$0xff] %v974_v34 }
 0x1b9   : > { %v1065_v50 = vpop.f32.mrf.mxu2  ;;  %v1157_v44 = vpop.f32.mrf.mxu3 }
 0x1ba   : > { %v1158_v51 = vadd.f32 %v1157_v44, %v1065_v50 }
 0x1bc   : > { %1222 = vst [vmem:[%s2292_s10 + $0xb8] sm:$0xff] %v1158_v51  ;;  %v884_v29 = vpop.f32.mrf.mxu0  ;;  %v976_v35 = vpop.f32.mrf.mxu1 }
 0x1bd   : > { %v977_v45 = vadd.f32 %v976_v35, %v884_v29 }
 0x1bf   : > { %1223 = vst [vmem:[%s2292_s10 + $0xc0] sm:$0xff] %v977_v45 }
 0x1c1   : > { %v1068_v18 = vpop.f32.mrf.mxu2  ;;  %v1160_v1 = vpop.f32.mrf.mxu3 }
 0x1c2   : > { %v1161_v19 = vadd.f32 %v1160_v1, %v1068_v18 }
 0x1c4   : > { %1224 = vst [vmem:[%s2292_s10 + $0xc8] sm:$0xff] %v1161_v19  ;;  %v887_v26 = vpop.f32.mrf.mxu0  ;;  %v979_v47 = vpop.f32.mrf.mxu1 }
 0x1c5   : > { %v980_v46 = vadd.f32 %v979_v47, %v887_v26 }
 0x1c7   : > { %1225 = vst [vmem:[%s2292_s10 + $0xd0] sm:$0xff] %v980_v46 }
 0x1c9   : > { %v1071_v52 = vpop.f32.mrf.mxu2  ;;  %v1163_v36 = vpop.f32.mrf.mxu3 }
 0x1ca   : > { %v1164_v16 = vadd.f32 %v1163_v36, %v1071_v52 }
 0x1cc   : > { %1226 = vst [vmem:[%s2292_s10 + $0xd8] sm:$0xff] %v1164_v16  ;;  %v890_v8 = vpop.f32.mrf.mxu0  ;;  %v982_v31 = vpop.f32.mrf.mxu1 }
 0x1cd   : > { %v983_v53 = vadd.f32 %v982_v31, %v890_v8 }
 0x1cf   : > { %1227 = vst [vmem:[%s2292_s10 + $0xe0] sm:$0xff] %v983_v53  ;;  %v1271_v53 = vld [vmem:[%s2292_s10] sm:$0xff] (%p1553_p5) }
 0x1d0   : > { %1272 = vst [vmem:[%s2395_s23] sm:$0xff] (%p1553_p5), %v1271_v53 }
 0x1d1   : > { %v1074_v59 = vpop.f32.mrf.mxu2  ;;  %v1166_v7 = vpop.f32.mrf.mxu3 }
 0x1d2   : > { %v1167_v38 = vadd.f32 %v1166_v7, %v1074_v59  ;;  %v1273_v59 = vld [vmem:[%s2292_s10 + $0x8] sm:$0xff] (%p1553_p5)  ;;  %v1275_v7 = vld [vmem:[%s2292_s10 + $0x10] sm:$0xff] (%p1553_p5) }
 0x1d3   : > { %1274 = vst [vmem:[%s2395_s23 + $0x8] sm:$0xff] (%p1553_p5), %v1273_v59 }
 0x1d4   : > { %1228 = vst [vmem:[%s2292_s10 + $0xe8] sm:$0xff] %v1167_v38  ;;  %v893_v13 = vpop.f32.mrf.mxu0  ;;  %v985_v11 = vpop.f32.mrf.mxu1  ;;  %v1277_v38 = vld [vmem:[%s2292_s10 + $0x18] sm:$0xff] (%p1553_p5) }
 0x1d5   : > { %v986_v22 = vadd.f32 %v985_v11, %v893_v13  ;;  %v1279_v13 = vld [vmem:[%s2292_s10 + $0x20] sm:$0xff] (%p1553_p5)  ;;  %1276 = vst [vmem:[%s2395_s23 + $0x40] sm:$0xff] (%p1553_p5), %v1275_v7  ;;  %v1281_v11 = vld [vmem:[%s2292_s10 + $0x28] sm:$0xff] (%p1553_p5) }
 0x1d6   : > { %1278 = vst [vmem:[%s2395_s23 + $0x48] sm:$0xff] (%p1553_p5), %v1277_v38 }
 0x1d7   : > { %1229 = vst [vmem:[%s2292_s10 + $0xf0] sm:$0xff] %v986_v22  ;;  %v1283_v22 = vld [vmem:[%s2292_s10 + $0x30] sm:$0xff] (%p1553_p5) }
 0x1d8   : > { %1280 = vst [vmem:[%s2395_s23 + $0x80] sm:$0xff] (%p1553_p5), %v1279_v13 }
 0x1d9   : > { %v1077_v60 = vpop.f32.mrf.mxu2  ;;  %v1169_v4 = vpop.f32.mrf.mxu3  ;;  %1282 = vst [vmem:[%s2395_s23 + $0x88] sm:$0xff] (%p1553_p5), %v1281_v11 }
 0x1da   : > { %v1170_v30 = vadd.f32 %v1169_v4, %v1077_v60  ;;  %v1285_v60 = vld [vmem:[%s2292_s10 + $0x38] sm:$0xff] (%p1553_p5)  ;;  %v1287_v4 = vld [vmem:[%s2292_s10 + $0x40] sm:$0xff] (%p1553_p5)  ;;  %1284 = vst [vmem:[%s2395_s23 + $0xc0] sm:$0xff] (%p1553_p5), %v1283_v22 }
 0x1db   : > { %1286 = vst [vmem:[%s2395_s23 + $0xc8] sm:$0xff] (%p1553_p5), %v1285_v60 }
 0x1dc   : > { %1230 = vst [vmem:[%s2292_s10 + $0xf8] sm:$0xff] %v1170_v30  ;;  %v896_v43 = vpop.f32.mrf.mxu0  ;;  %v988_v62 = vpop.f32.mrf.mxu1  ;;  %v1289_v30 = vld [vmem:[%s2292_s10 + $0x48] sm:$0xff] (%p1553_p5) }
 0x1dd   : > { %v989_v27 = vadd.f32 %v988_v62, %v896_v43  ;;  %v1291_v43 = vld [vmem:[%s2292_s10 + $0x50] sm:$0xff] (%p1553_p5)  ;;  %1288 = vst [vmem:[%s2395_s23 + $0x100] sm:$0xff] (%p1553_p5), %v1287_v4  ;;  %v1293_v62 = vld [vmem:[%s2292_s10 + $0x58] sm:$0xff] (%p1553_p5) }
 0x1de   : > { %1290 = vst [vmem:[%s2395_s23 + $0x108] sm:$0xff] (%p1553_p5), %v1289_v30 }
 0x1df   : > { %1231 = vst [vmem:[%s2292_s10 + $0x100] sm:$0xff] %v989_v27  ;;  %v1295_v27 = vld [vmem:[%s2292_s10 + $0x60] sm:$0xff] (%p1553_p5) }
 0x1e0   : > { %1292 = vst [vmem:[%s2395_s23 + $0x140] sm:$0xff] (%p1553_p5), %v1291_v43 }
 0x1e1   : > { %v1080_v39 = vpop.f32.mrf.mxu2  ;;  %v1172_v21 = vpop.f32.mrf.mxu3  ;;  %1294 = vst [vmem:[%s2395_s23 + $0x148] sm:$0xff] (%p1553_p5), %v1293_v62 }
 0x1e2   : > { %v1173_v5 = vadd.f32 %v1172_v21, %v1080_v39  ;;  %v1297_v39 = vld [vmem:[%s2292_s10 + $0x68] sm:$0xff] (%p1553_p5)  ;;  %v1299_v21 = vld [vmem:[%s2292_s10 + $0x70] sm:$0xff] (%p1553_p5)  ;;  %1296 = vst [vmem:[%s2395_s23 + $0x180] sm:$0xff] (%p1553_p5), %v1295_v27 }
 0x1e3   : > { %1298 = vst [vmem:[%s2395_s23 + $0x188] sm:$0xff] (%p1553_p5), %v1297_v39 }
 0x1e4   : > { %1232 = vst [vmem:[%s2292_s10 + $0x108] sm:$0xff] %v1173_v5  ;;  %v899_v17 = vpop.f32.mrf.mxu0  ;;  %v991_v20 = vpop.f32.mrf.mxu1  ;;  %v1301_v5 = vld [vmem:[%s2292_s10 + $0x78] sm:$0xff] (%p1553_p5) }
 0x1e5   : > { %v992_v37 = vadd.f32 %v991_v20, %v899_v17  ;;  %v1303_v17 = vld [vmem:[%s2292_s10 + $0x80] sm:$0xff] (%p1553_p5)  ;;  %1300 = vst [vmem:[%s2395_s23 + $0x1c0] sm:$0xff] (%p1553_p5), %v1299_v21  ;;  %v1305_v20 = vld [vmem:[%s2292_s10 + $0x88] sm:$0xff] (%p1553_p5) }
 0x1e6   : > { %1302 = vst [vmem:[%s2395_s23 + $0x1c8] sm:$0xff] (%p1553_p5), %v1301_v5 }
 0x1e7   : > { %1233 = vst [vmem:[%s2292_s10 + $0x110] sm:$0xff] %v992_v37  ;;  %v1307_v37 = vld [vmem:[%s2292_s10 + $0x90] sm:$0xff] (%p1553_p5) }
 0x1e8   : > { %1304 = vst [vmem:[%s2395_s23 + $0x200] sm:$0xff] (%p1553_p5), %v1303_v17 }
 0x1e9   : > { %v1083_v63 = vpop.f32.mrf.mxu2  ;;  %v1175_v2 = vpop.f32.mrf.mxu3  ;;  %1306 = vst [vmem:[%s2395_s23 + $0x208] sm:$0xff] (%p1553_p5), %v1305_v20 }
 0x1ea   : > { %v1176_v58 = vadd.f32 %v1175_v2, %v1083_v63  ;;  %v1309_v63 = vld [vmem:[%s2292_s10 + $0x98] sm:$0xff] (%p1553_p5)  ;;  %v1311_v2 = vld [vmem:[%s2292_s10 + $0xa0] sm:$0xff] (%p1553_p5)  ;;  %1308 = vst [vmem:[%s2395_s23 + $0x240] sm:$0xff] (%p1553_p5), %v1307_v37 }
 0x1eb   : > { %1310 = vst [vmem:[%s2395_s23 + $0x248] sm:$0xff] (%p1553_p5), %v1309_v63 }
 0x1ec   : > { %1234 = vst [vmem:[%s2292_s10 + $0x118] sm:$0xff] %v1176_v58  ;;  %v902_v48 = vpop.f32.mrf.mxu0  ;;  %v994_v61 = vpop.f32.mrf.mxu1  ;;  %v1313_v58 = vld [vmem:[%s2292_s10 + $0xa8] sm:$0xff] (%p1553_p5) }
 0x1ed   : > { %v995_v33 = vadd.f32 %v994_v61, %v902_v48  ;;  %v1315_v48 = vld [vmem:[%s2292_s10 + $0xb0] sm:$0xff] (%p1553_p5)  ;;  %1312 = vst [vmem:[%s2395_s23 + $0x280] sm:$0xff] (%p1553_p5), %v1311_v2  ;;  %v1317_v61 = vld [vmem:[%s2292_s10 + $0xb8] sm:$0xff] (%p1553_p5) }
 0x1ee   : > { %1314 = vst [vmem:[%s2395_s23 + $0x288] sm:$0xff] (%p1553_p5), %v1313_v58 }
 0x1ef   : > { %1235 = vst [vmem:[%s2292_s10 + $0x120] sm:$0xff] %v995_v33  ;;  %v1319_v33 = vld [vmem:[%s2292_s10 + $0xc0] sm:$0xff] (%p1553_p5) }
 0x1f0   : > { %1316 = vst [vmem:[%s2395_s23 + $0x2c0] sm:$0xff] (%p1553_p5), %v1315_v48 }
 0x1f1   : > { %v1086_v14 = vpop.f32.mrf.mxu2  ;;  %v1178_v32 = vpop.f32.mrf.mxu3  ;;  %1318 = vst [vmem:[%s2395_s23 + $0x2c8] sm:$0xff] (%p1553_p5), %v1317_v61 }
 0x1f2   : > { %v1179_v54 = vadd.f32 %v1178_v32, %v1086_v14  ;;  %v1321_v14 = vld [vmem:[%s2292_s10 + $0xc8] sm:$0xff] (%p1553_p5)  ;;  %v1323_v32 = vld [vmem:[%s2292_s10 + $0xd0] sm:$0xff] (%p1553_p5)  ;;  %1320 = vst [vmem:[%s2395_s23 + $0x300] sm:$0xff] (%p1553_p5), %v1319_v33 }
 0x1f3   : > { %1322 = vst [vmem:[%s2395_s23 + $0x308] sm:$0xff] (%p1553_p5), %v1321_v14 }
 0x1f4   : > { %1236 = vst [vmem:[%s2292_s10 + $0x128] sm:$0xff] %v1179_v54  ;;  %v905_v3 = vpop.f32.mrf.mxu0  ;;  %v997_v57 = vpop.f32.mrf.mxu1  ;;  %v1325_v54 = vld [vmem:[%s2292_s10 + $0xd8] sm:$0xff] (%p1553_p5) }
 0x1f5   : > { %v998_v25 = vadd.f32 %v997_v57, %v905_v3  ;;  %v1327_v3 = vld [vmem:[%s2292_s10 + $0xe0] sm:$0xff] (%p1553_p5)  ;;  %1324 = vst [vmem:[%s2395_s23 + $0x340] sm:$0xff] (%p1553_p5), %v1323_v32  ;;  %v1329_v57 = vld [vmem:[%s2292_s10 + $0xe8] sm:$0xff] (%p1553_p5) }
 0x1f6   : > { %1326 = vst [vmem:[%s2395_s23 + $0x348] sm:$0xff] (%p1553_p5), %v1325_v54 }
 0x1f7   : > { %1237 = vst [vmem:[%s2292_s10 + $0x130] sm:$0xff] %v998_v25  ;;  %v1331_v25 = vld [vmem:[%s2292_s10 + $0xf0] sm:$0xff] (%p1553_p5) }
 0x1f8   : > { %1328 = vst [vmem:[%s2395_s23 + $0x380] sm:$0xff] (%p1553_p5), %v1327_v3 }
 0x1f9   : > { %v1089_v9 = vpop.f32.mrf.mxu2  ;;  %v1181_v41 = vpop.f32.mrf.mxu3  ;;  %1330 = vst [vmem:[%s2395_s23 + $0x388] sm:$0xff] (%p1553_p5), %v1329_v57 }
 0x1fa   : > { %v1182_v55 = vadd.f32 %v1181_v41, %v1089_v9  ;;  %v1333_v9 = vld [vmem:[%s2292_s10 + $0xf8] sm:$0xff] (%p1553_p5)  ;;  %v1335_v41 = vld [vmem:[%s2292_s10 + $0x100] sm:$0xff] (%p1553_p5)  ;;  %1332 = vst [vmem:[%s2395_s23 + $0x3c0] sm:$0xff] (%p1553_p5), %v1331_v25 }
 0x1fb   : > { %1334 = vst [vmem:[%s2395_s23 + $0x3c8] sm:$0xff] (%p1553_p5), %v1333_v9 }
 0x1fc   : > { %1238 = vst [vmem:[%s2292_s10 + $0x138] sm:$0xff] %v1182_v55  ;;  %v908_v40 = vpop.f32.mrf.mxu0  ;;  %v1000_v0 = vpop.f32.mrf.mxu1  ;;  %v1337_v55 = vld [vmem:[%s2292_s10 + $0x108] sm:$0xff] (%p1553_p5) }
 0x1fd   : > { %v1001_v12 = vadd.f32 %v1000_v0, %v908_v40  ;;  %v1339_v40 = vld [vmem:[%s2292_s10 + $0x110] sm:$0xff] (%p1553_p5)  ;;  %1336 = vst [vmem:[%s2395_s23 + $0x400] sm:$0xff] (%p1553_p5), %v1335_v41  ;;  %v1341_v0 = vld [vmem:[%s2292_s10 + $0x118] sm:$0xff] (%p1553_p5) }
 0x1fe   : > { %1338 = vst [vmem:[%s2395_s23 + $0x408] sm:$0xff] (%p1553_p5), %v1337_v55 }
 0x1ff   : > { %1239 = vst [vmem:[%s2292_s10 + $0x140] sm:$0xff] %v1001_v12  ;;  %v1343_v12 = vld [vmem:[%s2292_s10 + $0x120] sm:$0xff] (%p1553_p5) }
 0x200   : > { %1340 = vst [vmem:[%s2395_s23 + $0x440] sm:$0xff] (%p1553_p5), %v1339_v40 }
 0x201   : > { %v1092_v28 = vpop.f32.mrf.mxu2  ;;  %v1184_v10 = vpop.f32.mrf.mxu3  ;;  %1342 = vst [vmem:[%s2395_s23 + $0x448] sm:$0xff] (%p1553_p5), %v1341_v0 }
 0x202   : > { %v1185_v23 = vadd.f32 %v1184_v10, %v1092_v28  ;;  %v1345_v28 = vld [vmem:[%s2292_s10 + $0x128] sm:$0xff] (%p1553_p5)  ;;  %v1347_v10 = vld [vmem:[%s2292_s10 + $0x130] sm:$0xff] (%p1553_p5)  ;;  %1344 = vst [vmem:[%s2395_s23 + $0x480] sm:$0xff] (%p1553_p5), %v1343_v12 }
 0x203   : > { %1346 = vst [vmem:[%s2395_s23 + $0x488] sm:$0xff] (%p1553_p5), %v1345_v28 }
 0x204   : > { %1240 = vst [vmem:[%s2292_s10 + $0x148] sm:$0xff] %v1185_v23  ;;  %v911_v49 = vpop.f32.mrf.mxu0  ;;  %v1003_v42 = vpop.f32.mrf.mxu1  ;;  %v1349_v23 = vld [vmem:[%s2292_s10 + $0x138] sm:$0xff] (%p1553_p5) }
 0x205   : > { %v1004_v6 = vadd.f32 %v1003_v42, %v911_v49  ;;  %1348 = vst [vmem:[%s2395_s23 + $0x4c0] sm:$0xff] (%p1553_p5), %v1347_v10 }
 0x206   : > { %v1351_v49 = vld [vmem:[%s2292_s10 + $0x140] sm:$0xff] (%p1553_p5)  ;;  %1350 = vst [vmem:[%s2395_s23 + $0x4c8] sm:$0xff] (%p1553_p5), %v1349_v23 }
 0x207   : > { %1241 = vst [vmem:[%s2292_s10 + $0x150] sm:$0xff] %v1004_v6 }
 0x208   : > { %1352 = vst [vmem:[%s2395_s23 + $0x500] sm:$0xff] (%p1553_p5), %v1351_v49 }
 0x209   : > { %v1095_v15 = vpop.f32.mrf.mxu2  ;;  %v1187_v56 = vpop.f32.mrf.mxu3 }
 0x20a   : > { %v1188_v24 = vadd.f32 %v1187_v56, %v1095_v15 }
 0x20b   : > { %v1353_v42 = vld [vmem:[%s2292_s10 + $0x148] sm:$0xff] (%p1553_p5) }
 0x20c   : > { %1242 = vst [vmem:[%s2292_s10 + $0x158] sm:$0xff] %v1188_v24  ;;  %v914_v34 = vpop.f32.mrf.mxu0  ;;  %v1006_v50 = vpop.f32.mrf.mxu1 }
 0x20d   : > { %v1007_v44 = vadd.f32 %v1006_v50, %v914_v34  ;;  %1354 = vst [vmem:[%s2395_s23 + $0x508] sm:$0xff] (%p1553_p5), %v1353_v42 }
 0x20e   : > { %v1355_v6 = vld [vmem:[%s2292_s10 + $0x150] sm:$0xff] (%p1553_p5) }
 0x20f   : > { %1243 = vst [vmem:[%s2292_s10 + $0x160] sm:$0xff] %v1007_v44 }
 0x210   : > { %1356 = vst [vmem:[%s2395_s23 + $0x540] sm:$0xff] (%p1553_p5), %v1355_v6 }
 0x211   : > { %v1098_v51 = vpop.f32.mrf.mxu2  ;;  %v1190_v29 = vpop.f32.mrf.mxu3 }
 0x212   : > { %v1191_v35 = vadd.f32 %v1190_v29, %v1098_v51 }
 0x213   : > { %v1357_v15 = vld [vmem:[%s2292_s10 + $0x158] sm:$0xff] (%p1553_p5) }
 0x214   : > { %1244 = vst [vmem:[%s2292_s10 + $0x168] sm:$0xff] %v1191_v35  ;;  %v917_v45 = vpop.f32.mrf.mxu0  ;;  %v1009_v18 = vpop.f32.mrf.mxu1 }
 0x215   : > { %v1010_v1 = vadd.f32 %v1009_v18, %v917_v45  ;;  %1358 = vst [vmem:[%s2395_s23 + $0x548] sm:$0xff] (%p1553_p5), %v1357_v15 }
 0x216   : > { %v1359_v56 = vld [vmem:[%s2292_s10 + $0x160] sm:$0xff] (%p1553_p5) }
 0x217   : > { %1245 = vst [vmem:[%s2292_s10 + $0x170] sm:$0xff] %v1010_v1 }
 0x218   : > { %1360 = vst [vmem:[%s2395_s23 + $0x580] sm:$0xff] (%p1553_p5), %v1359_v56 }
 0x219   : > { %v1101_v19 = vpop.f32.mrf.mxu2  ;;  %v1193_v26 = vpop.f32.mrf.mxu3 }
 0x21a   : > { %v1194_v47 = vadd.f32 %v1193_v26, %v1101_v19 }
 0x21b   : > { %v1361_v24 = vld [vmem:[%s2292_s10 + $0x168] sm:$0xff] (%p1553_p5) }
 0x21c   : > { %1246 = vst [vmem:[%s2292_s10 + $0x178] sm:$0xff] %v1194_v47  ;;  %v920_v46 = vpop.f32.mrf.mxu0  ;;  %v1012_v52 = vpop.f32.mrf.mxu1 }
 0x21d   : > { %v1013_v36 = vadd.f32 %v1012_v52, %v920_v46  ;;  %1362 = vst [vmem:[%s2395_s23 + $0x588] sm:$0xff] (%p1553_p5), %v1361_v24 }
 0x21e   : > { %v1363_v34 = vld [vmem:[%s2292_s10 + $0x170] sm:$0xff] (%p1553_p5) }
 0x21f   : > { %1247 = vst [vmem:[%s2292_s10 + $0x180] sm:$0xff] %v1013_v36 }
 0x220   : > { %1255 = sbr.rel (!%p1553_p5) target bundleno = 557 (0x22d), region = 63  ;;  %1364 = vst [vmem:[%s2395_s23 + $0x5c0] sm:$0xff] (%p1553_p5), %v1363_v34 }
 0x221   : > { %v1104_v16 = vpop.f32.mrf.mxu2  ;;  %v1196_v8 = vpop.f32.mrf.mxu3 }
 0x222   : > { %v1197_v31 = vadd.f32 %v1196_v8, %v1104_v16 }
 0x223   : > { %v1365_v50 = vld [vmem:[%s2292_s10 + $0x178] sm:$0xff] (%p1553_p5) }
 0x224   : > { %1248 = vst [vmem:[%s2292_s10 + $0x188] sm:$0xff] %v1197_v31 }
 0x225   : > { %1366 = vst [vmem:[%s2395_s23 + $0x5c8] sm:$0xff] %v1365_v50 }
 0x226   : > { %v1367_v44 = vld [vmem:[%s2292_s10 + $0x180] sm:$0xff] }
 0x227   : > { %1368 = vst [vmem:[%s2395_s23 + $0x600] sm:$0xff] %v1367_v44 }
 0x22b   : > { %v1369_v51 = vld [vmem:[%s2292_s10 + $0x188] sm:$0xff] }
 0x22c   : > { %1370 = vst [vmem:[%s2395_s23 + $0x608] sm:$0xff] %v1369_v51 }
 0x22d PF: > { %p11_p10 = scmp.ge.s32.totalorder %s1540_s19, 6   ;;  %s2556_s15 = smov %s1492_s16 }
 0x22e   : > { %s2557_s16 = smov %s1551_s22  ;;  %s2558_s17 = smov %s1540_s19 }
 0x22f   :  { %13 = sbr.rel (!%p11_p10) target bundleno = 2 (0x2), region = 117 }

</bundles_post_ra>
